<compile_context>
chip_gen: v7x
topology: tpu7x:2x2x1
jax: 0.10.0
libtpu: 0.0.40
codegen_flags: <defaults>
</compile_context>

<pallas_src>
import functools
import math

import jax
import jax.numpy as jnp
from jax.experimental import pallas as pl
from jax.experimental.pallas import tpu as pltpu


# ----------------------------------------------------------------------------
# Fused ShuffleBlock1D kernel: one grid step per batch block (NCL layout).
# ----------------------------------------------------------------------------
def shuffle_block_kernel(x_ref, w1_ref, b1_ref, wd_ref, bd_ref, w2_ref, b2_ref,
                         o_ref, *, matmul_dtype):
    TB, C, L = x_ref.shape

    # (1, L) boundary masks for in-register zero padding of the depthwise conv
    # (cheap: one vreg row of iota/compare instead of a full (C, L) select).
    lane = jax.lax.broadcasted_iota(jnp.int32, (1, L), 1)
    left_mask = (lane != 0).astype(jnp.float32)        # kills wrapped col of x[l-1]
    right_mask = (lane != L - 1).astype(jnp.float32)   # kills wrapped col of x[l+1]

    # Weights / biases loaded once per grid step, reused across the TB loop.
    w1 = w1_ref[...]                                   # (C, C) bf16 (pre-cast)
    w2 = w2_ref[...]                                   # (C, C) bf16 (pre-cast)
    wd0 = wd_ref[:, 0:1]                               # (C, 1) f32 depthwise taps
    wd1 = wd_ref[:, 1:2]
    wd2 = wd_ref[:, 2:3]
    b1 = b1_ref[...]                                   # (C, 1) f32
    bd = bd_ref[...]
    b2 = b2_ref[...]

    # Static unroll over the TB batch elements in this block.
    for i in range(TB):
        xb = x_ref[i]                                  # (C, L) f32
        xb_m = xb.astype(matmul_dtype)

        # ---- branch 1: 1x1 conv (+ folded BN) -> ReLU -----------------------
        y1 = jnp.dot(w1, xb_m, preferred_element_type=jnp.float32) + b1
        y1 = jnp.maximum(y1, 0.0)

        # ---- branch 2: depthwise 3-tap conv, pad=1 (+ folded BN) -------------
        x_prev = pltpu.roll(xb, shift=1, axis=1) * left_mask        # x[l-1]
        x_next = pltpu.roll(xb, shift=L - 1, axis=1) * right_mask   # x[l+1]
        dw = x_prev * wd0 + xb * wd1 + x_next * wd2 + bd

        # ---- branch 2 cont.: 1x1 conv (+ folded BN) -> ReLU ------------------
        y2 = jnp.dot(w2, dw.astype(matmul_dtype),
                     preferred_element_type=jnp.float32) + b2
        y2 = jnp.maximum(y2, 0.0)

        # ---- residual add of the two branches --------------------------------
        # (kept f32 to match the PyTorch module; switch to bf16 output if the
        #  consumer tolerates it -- cuts HBM writeback traffic in half)
        o_ref[i] = y1 + y2


def shuffle_block_forward(x_ncl, params, matmul_dtype=jnp.bfloat16, max_tb=8):
    B, C, L = x_ncl.shape
    assert L >= 2, "depthwise pad=1 path assumes L >= 2"

    # Largest batch sub-block <= max_tb that divides B (keeps blocks aligned,
    # no partial-block masking needed).
    tb = 1
    for cand in range(min(B, max_tb), 0, -1):
        if B % cand == 0:
            tb = cand
            break

    # Pre-cast the 1x1 weights to bf16 once in the wrapper (halves their
    # DMA/VMEM bytes and removes the per-step in-kernel casts).
    w1 = params['w1'].astype(matmul_dtype)
    w2 = params['w2'].astype(matmul_dtype)

    # Rough VMEM budget: x + out blocks double-buffered + weights double-buffered.
    vmem_est = (
        4 * tb * C * L * 4                 # x block + out block, 2 buffers each
        + 2 * 2 * C * C * 2                # w1, w2 (bf16), 2 buffers each
        + 2 * (C * 3 + 3 * C * 1) * 4      # wd + biases (f32), 2 buffers each
    )
    cp_kwargs = dict(dimension_semantics=("parallel",))
    if vmem_est > (16 << 20):              # above v5e's default scoped-VMEM limit
        cp_kwargs["vmem_limit_bytes"] = min(vmem_est + (4 << 20), 100 << 20)

    kernel = functools.partial(shuffle_block_kernel, matmul_dtype=matmul_dtype)
    return pl.pallas_call(
        kernel,
        out_shape=jax.ShapeDtypeStruct((B, C, L), jnp.float32),
        grid=(B // tb,),
        in_specs=[
            pl.BlockSpec((tb, C, L), lambda b: (b, 0, 0)),   # x
            pl.BlockSpec((C, C), lambda b: (0, 0)),          # w1 (BN folded, bf16)
            pl.BlockSpec((C, 1), lambda b: (0, 0)),          # b1 (BN folded)
            pl.BlockSpec((C, 3), lambda b: (0, 0)),          # depthwise taps (BN folded)
            pl.BlockSpec((C, 1), lambda b: (0, 0)),          # depthwise bias (BN folded)
            pl.BlockSpec((C, C), lambda b: (0, 0)),          # w2 (BN folded, bf16)
            pl.BlockSpec((C, 1), lambda b: (0, 0)),          # b2 (BN folded)
        ],
        out_specs=pl.BlockSpec((tb, C, L), lambda b: (b, 0, 0)),
        compiler_params=pltpu.CompilerParams(**cp_kwargs),
    )(x_ncl, w1, params['b1'], params['wd'], params['bd'], w2, params['b2'])


# ----------------------------------------------------------------------------
# Deterministic parameters + eval-mode BatchNorm fold.
# ----------------------------------------------------------------------------
def make_params(key, C, eps=1e-5):
    ks = jax.random.split(key, 9)

    def uconv(k, shape, fan_in):
        bound = 1.0 / math.sqrt(fan_in)
        return jax.random.uniform(k, shape, jnp.float32, -bound, bound)

    def bn(k):
        k1, k2, k3, k4 = jax.random.split(k, 4)
        return dict(
            gamma=jax.random.uniform(k1, (C,), jnp.float32, 0.5, 1.5),
            beta=0.1 * jax.random.normal(k2, (C,), jnp.float32),
            mean=0.1 * jax.random.normal(k3, (C,), jnp.float32),
            var=jax.random.uniform(k4, (C,), jnp.float32, 0.5, 1.5),
        )

    raw = {
        'w1': uconv(ks[0], (C, C), C),       # Conv1d(C,C,1).weight squeezed
        'b1': uconv(ks[1], (C,), C),
        'bn1': bn(ks[2]),
        'wd': uconv(ks[3], (C, 3), 3),       # depthwise Conv1d(C,C,3,groups=C)
        'bd': uconv(ks[4], (C,), 3),
        'bna': bn(ks[5]),
        'w2': uconv(ks[6], (C, C), C),
        'b2': uconv(ks[7], (C,), C),
        'bnb': bn(ks[8]),
    }

    def fold(p):
        s = p['gamma'] / jnp.sqrt(p['var'] + eps)
        t = p['beta'] - p['mean'] * s
        return s, t

    s1, t1 = fold(raw['bn1'])
    sa, ta = fold(raw['bna'])
    sb, tb = fold(raw['bnb'])

    folded = {
        'w1': s1[:, None] * raw['w1'],
        'b1': (s1 * raw['b1'] + t1)[:, None],
        'wd': sa[:, None] * raw['wd'],
        'bd': (sa * raw['bd'] + ta)[:, None],
        'w2': sb[:, None] * raw['w2'],
        'b2': (sb * raw['b2'] + tb)[:, None],
    }
    return raw, folded


# ----------------------------------------------------------------------------
# Pure-JAX f32 reference (unfolded params) for a correctness check.
# ----------------------------------------------------------------------------
def shuffle_block_ref(x, raw, eps=1e-5):
    def bn(y, p):
        s = p['gamma'] / jnp.sqrt(p['var'] + eps)
        t = p['beta'] - p['mean'] * s
        return y * s[None, :, None] + t[None, :, None]

    y1 = jnp.einsum('oc,bcl->bol', raw['w1'], x) + raw['b1'][None, :, None]
    y1 = jnp.maximum(bn(y1, raw['bn1']), 0.0)

    xp = jnp.pad(x, ((0, 0), (0, 0), (1, 1)))
    dw = (xp[:, :, :-2] * raw['wd'][None, :, 0:1]
          + xp[:, :, 1:-1] * raw['wd'][None, :, 1:2]
          + xp[:, :, 2:] * raw['wd'][None, :, 2:3]
          + raw['bd'][None, :, None])
    dw = bn(dw, raw['bna'])
    y2 = jnp.einsum('oc,bcl->bol', raw['w2'], dw) + raw['b2'][None, :, None]
    y2 = jnp.maximum(bn(y2, raw['bnb']), 0.0)
    return y1 + y2


if __name__ == "__main__":
    key = jax.random.PRNGKey(0)
    k_param, k_x = jax.random.split(key)

    # Small shapes consistent with the module: (batch, in_channels, length).
    B, C, L = 2, 128, 128
    raw, folded = make_params(k_param, C)
    x = jax.random.normal(k_x, (B, C, L), jnp.float32)

    out = jax.jit(shuffle_block_forward)(x, folded)
    out = jax.block_until_ready(out)

    ref = shuffle_block_ref(x, raw)
    assert out.shape == (B, C, L)
    assert bool(jnp.all(jnp.isfinite(out)))
    abs_err = float(jnp.max(jnp.abs(out - ref)))
    rel_err = abs_err / max(float(jnp.max(jnp.abs(ref))), 1e-6)
    assert rel_err < 3e-2, f"rel err {rel_err} (abs {abs_err}) vs reference"
    print("KERNEL_OK")
</pallas_src>

<mosaic_0001>
module attributes {stable_mosaic.version = 11 : i64} {
  func.func @shuffle_block_kernel(%arg0: i32, %arg1: memref<2x128x128xf32, #tpu.memory_space<vmem>>, %arg2: memref<128x128xbf16, #tpu.memory_space<vmem>>, %arg3: memref<128x1xf32, #tpu.memory_space<vmem>>, %arg4: memref<128x3xf32, #tpu.memory_space<vmem>>, %arg5: memref<128x1xf32, #tpu.memory_space<vmem>>, %arg6: memref<128x128xbf16, #tpu.memory_space<vmem>>, %arg7: memref<128x1xf32, #tpu.memory_space<vmem>>, %arg8: memref<2x128x128xf32, #tpu.memory_space<vmem>>) attributes {dimension_semantics = [#tpu.dimension_semantics<parallel>], iteration_bounds = array<i64: 1>, scalar_prefetch = 0 : i64, scratch_operands = 0 : i64, tpu.core_type = #tpu.core_type<tc>, window_params = [{transform_indices = @transform_0, window_bounds = array<i64: 2, 128, 128>}, {pipeline_mode = #tpu.pipeline_mode<synchronous>, transform_indices = @transform_1, window_bounds = array<i64: 128, 128>}, {pipeline_mode = #tpu.pipeline_mode<synchronous>, transform_indices = @transform_2, window_bounds = array<i64: 128, 1>}, {pipeline_mode = #tpu.pipeline_mode<synchronous>, transform_indices = @transform_3, window_bounds = array<i64: 128, 3>}, {pipeline_mode = #tpu.pipeline_mode<synchronous>, transform_indices = @transform_4, window_bounds = array<i64: 128, 1>}, {pipeline_mode = #tpu.pipeline_mode<synchronous>, transform_indices = @transform_5, window_bounds = array<i64: 128, 128>}, {pipeline_mode = #tpu.pipeline_mode<synchronous>, transform_indices = @transform_6, window_bounds = array<i64: 128, 1>}, {transform_indices = @transform_7, window_bounds = array<i64: 2, 128, 128>}]} {
    %0 = tpu.iota {dimensions = array<i32: 1>} : vector<1x128xi32>
    %c0_i32 = arith.constant 0 : i32
    %1 = vector.broadcast %c0_i32 : i32 to vector<1x128xi32>
    %2 = arith.cmpi ne, %0, %1 : vector<1x128xi32>
    %3 = arith.extui %2 : vector<1x128xi1> to vector<1x128xi32>
    %4 = arith.sitofp %3 : vector<1x128xi32> to vector<1x128xf32>
    %c127_i32 = arith.constant 127 : i32
    %5 = vector.broadcast %c127_i32 : i32 to vector<1x128xi32>
    %6 = arith.cmpi ne, %0, %5 : vector<1x128xi32>
    %7 = arith.extui %6 : vector<1x128xi1> to vector<1x128xi32>
    %8 = arith.sitofp %7 : vector<1x128xi32> to vector<1x128xf32>
    %c0 = arith.constant 0 : index
    %c0_0 = arith.constant 0 : index
    %9 = vector.load %arg2[%c0, %c0_0] : memref<128x128xbf16, #tpu.memory_space<vmem>>, vector<128x128xbf16>
    %c0_1 = arith.constant 0 : index
    %c0_2 = arith.constant 0 : index
    %10 = vector.load %arg6[%c0_1, %c0_2] : memref<128x128xbf16, #tpu.memory_space<vmem>>, vector<128x128xbf16>
    %c0_3 = arith.constant 0 : index
    %c0_4 = arith.constant 0 : index
    %11 = vector.load %arg4[%c0_3, %c0_4] : memref<128x3xf32, #tpu.memory_space<vmem>>, vector<128x1xf32>
    %c0_5 = arith.constant 0 : index
    %c1 = arith.constant 1 : index
    %12 = vector.load %arg4[%c0_5, %c1] : memref<128x3xf32, #tpu.memory_space<vmem>>, vector<128x1xf32>
    %c0_6 = arith.constant 0 : index
    %c2 = arith.constant 2 : index
    %13 = vector.load %arg4[%c0_6, %c2] : memref<128x3xf32, #tpu.memory_space<vmem>>, vector<128x1xf32>
    %c0_7 = arith.constant 0 : index
    %c0_8 = arith.constant 0 : index
    %14 = vector.load %arg3[%c0_7, %c0_8] : memref<128x1xf32, #tpu.memory_space<vmem>>, vector<128x1xf32>
    %c0_9 = arith.constant 0 : index
    %c0_10 = arith.constant 0 : index
    %15 = vector.load %arg5[%c0_9, %c0_10] : memref<128x1xf32, #tpu.memory_space<vmem>>, vector<128x1xf32>
    %c0_11 = arith.constant 0 : index
    %c0_12 = arith.constant 0 : index
    %16 = vector.load %arg7[%c0_11, %c0_12] : memref<128x1xf32, #tpu.memory_space<vmem>>, vector<128x1xf32>
    %c0_13 = arith.constant 0 : index
    %c0_14 = arith.constant 0 : index
    %c0_15 = arith.constant 0 : index
    %17 = vector.load %arg1[%c0_13, %c0_14, %c0_15] : memref<2x128x128xf32, #tpu.memory_space<vmem>>, vector<1x128x128xf32>
    %18 = vector.shape_cast %17 : vector<1x128x128xf32> to vector<128x128xf32>
    %19 = arith.truncf %18 : vector<128x128xf32> to vector<128x128xbf16>
    %cst = arith.constant dense<0.000000e+00> : vector<128x128xf32>
    %20 = tpu.matmul %9, %19, %cst {dimension_numbers = #tpu.dot_dimension_numbers<[1], [0], [0], [1], [0, 0, 1, 1], [], []>} : vector<128x128xbf16>, vector<128x128xbf16>, vector<128x128xf32> -> vector<128x128xf32>
    %21 = vector.broadcast %14 : vector<128x1xf32> to vector<128x128xf32>
    %22 = arith.addf %20, %21 : vector<128x128xf32>
    %cst_16 = arith.constant 0.000000e+00 : f32
    %23 = vector.broadcast %cst_16 : f32 to vector<128x128xf32>
    %24 = arith.maximumf %22, %23 : vector<128x128xf32>
    %c1_i32 = arith.constant 1 : i32
    %25 = tpu.dynamic_rotate %18 by %c1_i32 dim 1 : vector<128x128xf32>, i32 -> vector<128x128xf32>
    %26 = vector.broadcast %4 : vector<1x128xf32> to vector<128x128xf32>
    %27 = arith.mulf %25, %26 : vector<128x128xf32>
    %c127_i32_17 = arith.constant 127 : i32
    %28 = tpu.dynamic_rotate %18 by %c127_i32_17 dim 1 : vector<128x128xf32>, i32 -> vector<128x128xf32>
    %29 = vector.broadcast %8 : vector<1x128xf32> to vector<128x128xf32>
    %30 = arith.mulf %28, %29 : vector<128x128xf32>
    %31 = vector.broadcast %11 : vector<128x1xf32> to vector<128x128xf32>
    %32 = arith.mulf %27, %31 : vector<128x128xf32>
    %33 = vector.broadcast %12 : vector<128x1xf32> to vector<128x128xf32>
    %34 = arith.mulf %18, %33 : vector<128x128xf32>
    %35 = arith.addf %32, %34 : vector<128x128xf32>
    %36 = vector.broadcast %13 : vector<128x1xf32> to vector<128x128xf32>
    %37 = arith.mulf %30, %36 : vector<128x128xf32>
    %38 = arith.addf %35, %37 : vector<128x128xf32>
    %39 = vector.broadcast %15 : vector<128x1xf32> to vector<128x128xf32>
    %40 = arith.addf %38, %39 : vector<128x128xf32>
    %41 = arith.truncf %40 : vector<128x128xf32> to vector<128x128xbf16>
    %cst_18 = arith.constant dense<0.000000e+00> : vector<128x128xf32>
    %42 = tpu.matmul %10, %41, %cst_18 {dimension_numbers = #tpu.dot_dimension_numbers<[1], [0], [0], [1], [0, 0, 1, 1], [], []>} : vector<128x128xbf16>, vector<128x128xbf16>, vector<128x128xf32> -> vector<128x128xf32>
    %43 = vector.broadcast %16 : vector<128x1xf32> to vector<128x128xf32>
    %44 = arith.addf %42, %43 : vector<128x128xf32>
    %cst_19 = arith.constant 0.000000e+00 : f32
    %45 = vector.broadcast %cst_19 : f32 to vector<128x128xf32>
    %46 = arith.maximumf %44, %45 : vector<128x128xf32>
    %47 = arith.addf %24, %46 : vector<128x128xf32>
    %c0_20 = arith.constant 0 : index
    %c0_21 = arith.constant 0 : index
    %c0_22 = arith.constant 0 : index
    %48 = vector.load %arg8[%c0_20, %c0_21, %c0_22] : memref<2x128x128xf32, #tpu.memory_space<vmem>>, vector<1x128x128xf32>
    %49 = vector.shape_cast %48 : vector<1x128x128xf32> to vector<128x128xf32>
    %50 = vector.shape_cast %47 : vector<128x128xf32> to vector<1x128x128xf32>
    tpu.vector_store %arg8[%c0_20, %c0_21, %c0_22], %50 {strides = array<i32>} : memref<2x128x128xf32, #tpu.memory_space<vmem>>, vector<1x128x128xf32>,
    %c1_23 = arith.constant 1 : index
    %c0_24 = arith.constant 0 : index
    %c0_25 = arith.constant 0 : index
    %51 = vector.load %arg1[%c1_23, %c0_24, %c0_25] : memref<2x128x128xf32, #tpu.memory_space<vmem>>, vector<1x128x128xf32>
    %52 = vector.shape_cast %51 : vector<1x128x128xf32> to vector<128x128xf32>
    %53 = arith.truncf %52 : vector<128x128xf32> to vector<128x128xbf16>
    %cst_26 = arith.constant dense<0.000000e+00> : vector<128x128xf32>
    %54 = tpu.matmul %9, %53, %cst_26 {dimension_numbers = #tpu.dot_dimension_numbers<[1], [0], [0], [1], [0, 0, 1, 1], [], []>} : vector<128x128xbf16>, vector<128x128xbf16>, vector<128x128xf32> -> vector<128x128xf32>
    %55 = vector.broadcast %14 : vector<128x1xf32> to vector<128x128xf32>
    %56 = arith.addf %54, %55 : vector<128x128xf32>
    %cst_27 = arith.constant 0.000000e+00 : f32
    %57 = vector.broadcast %cst_27 : f32 to vector<128x128xf32>
    %58 = arith.maximumf %56, %57 : vector<128x128xf32>
    %c1_i32_28 = arith.constant 1 : i32
    %59 = tpu.dynamic_rotate %52 by %c1_i32_28 dim 1 : vector<128x128xf32>, i32 -> vector<128x128xf32>
    %60 = vector.broadcast %4 : vector<1x128xf32> to vector<128x128xf32>
    %61 = arith.mulf %59, %60 : vector<128x128xf32>
    %c127_i32_29 = arith.constant 127 : i32
    %62 = tpu.dynamic_rotate %52 by %c127_i32_29 dim 1 : vector<128x128xf32>, i32 -> vector<128x128xf32>
    %63 = vector.broadcast %8 : vector<1x128xf32> to vector<128x128xf32>
    %64 = arith.mulf %62, %63 : vector<128x128xf32>
    %65 = vector.broadcast %11 : vector<128x1xf32> to vector<128x128xf32>
    %66 = arith.mulf %61, %65 : vector<128x128xf32>
    %67 = vector.broadcast %12 : vector<128x1xf32> to vector<128x128xf32>
    %68 = arith.mulf %52, %67 : vector<128x128xf32>
    %69 = arith.addf %66, %68 : vector<128x128xf32>
    %70 = vector.broadcast %13 : vector<128x1xf32> to vector<128x128xf32>
    %71 = arith.mulf %64, %70 : vector<128x128xf32>
    %72 = arith.addf %69, %71 : vector<128x128xf32>
    %73 = vector.broadcast %15 : vector<128x1xf32> to vector<128x128xf32>
    %74 = arith.addf %72, %73 : vector<128x128xf32>
    %75 = arith.truncf %74 : vector<128x128xf32> to vector<128x128xbf16>
    %cst_30 = arith.constant dense<0.000000e+00> : vector<128x128xf32>
    %76 = tpu.matmul %10, %75, %cst_30 {dimension_numbers = #tpu.dot_dimension_numbers<[1], [0], [0], [1], [0, 0, 1, 1], [], []>} : vector<128x128xbf16>, vector<128x128xbf16>, vector<128x128xf32> -> vector<128x128xf32>
    %77 = vector.broadcast %16 : vector<128x1xf32> to vector<128x128xf32>
    %78 = arith.addf %76, %77 : vector<128x128xf32>
    %cst_31 = arith.constant 0.000000e+00 : f32
    %79 = vector.broadcast %cst_31 : f32 to vector<128x128xf32>
    %80 = arith.maximumf %78, %79 : vector<128x128xf32>
    %81 = arith.addf %58, %80 : vector<128x128xf32>
    %c1_32 = arith.constant 1 : index
    %c0_33 = arith.constant 0 : index
    %c0_34 = arith.constant 0 : index
    %82 = vector.load %arg8[%c1_32, %c0_33, %c0_34] : memref<2x128x128xf32, #tpu.memory_space<vmem>>, vector<1x128x128xf32>
    %83 = vector.shape_cast %82 : vector<1x128x128xf32> to vector<128x128xf32>
    %84 = vector.shape_cast %81 : vector<128x128xf32> to vector<1x128x128xf32>
    tpu.vector_store %arg8[%c1_32, %c0_33, %c0_34], %84 {strides = array<i32>} : memref<2x128x128xf32, #tpu.memory_space<vmem>>, vector<1x128x128xf32>,
    return
  }
  func.func @transform_0(%arg0: i32) -> (i32, i32, i32) {
    %c0_i32 = arith.constant 0 : i32
    %c0_i32_0 = arith.constant 0 : i32
    %c0_i32_1 = arith.constant 0 : i32
    return %arg0, %c0_i32, %c0_i32_0 : i32, i32, i32
  }
  func.func @transform_1(%arg0: i32) -> (i32, i32) {
    %c0_i32 = arith.constant 0 : i32
    %c0_i32_0 = arith.constant 0 : i32
    %c0_i32_1 = arith.constant 0 : i32
    return %c0_i32, %c0_i32_0 : i32, i32
  }
  func.func @transform_2(%arg0: i32) -> (i32, i32) {
    %c0_i32 = arith.constant 0 : i32
    %c0_i32_0 = arith.constant 0 : i32
    %c0_i32_1 = arith.constant 0 : i32
    return %c0_i32, %c0_i32_0 : i32, i32
  }
  func.func @transform_3(%arg0: i32) -> (i32, i32) {
    %c0_i32 = arith.constant 0 : i32
    %c0_i32_0 = arith.constant 0 : i32
    %c0_i32_1 = arith.constant 0 : i32
    return %c0_i32, %c0_i32_0 : i32, i32
  }
  func.func @transform_4(%arg0: i32) -> (i32, i32) {
    %c0_i32 = arith.constant 0 : i32
    %c0_i32_0 = arith.constant 0 : i32
    %c0_i32_1 = arith.constant 0 : i32
    return %c0_i32, %c0_i32_0 : i32, i32
  }
  func.func @transform_5(%arg0: i32) -> (i32, i32) {
    %c0_i32 = arith.constant 0 : i32
    %c0_i32_0 = arith.constant 0 : i32
    %c0_i32_1 = arith.constant 0 : i32
    return %c0_i32, %c0_i32_0 : i32, i32
  }
  func.func @transform_6(%arg0: i32) -> (i32, i32) {
    %c0_i32 = arith.constant 0 : i32
    %c0_i32_0 = arith.constant 0 : i32
    %c0_i32_1 = arith.constant 0 : i32
    return %c0_i32, %c0_i32_0 : i32, i32
  }
  func.func @transform_7(%arg0: i32) -> (i32, i32, i32) {
    %c0_i32 = arith.constant 0 : i32
    %c0_i32_0 = arith.constant 0 : i32
    %c0_i32_1 = arith.constant 0 : i32
    return %arg0, %c0_i32, %c0_i32_0 : i32, i32, i32
  }
}

</mosaic_0001>

<bundles_post_ra>
// kernel: shuffle_block_forward.1
= control target key start
LH: loop header
LB: loop body
LE: loop exit
PB: predicated region body
PF: predicated region fallthrough
CT: control target
= control target key end

     0   :  { %v3463_v3 = vmov 0   ;;  %s1989_s30 = smov 1   ;;  %v3468_v10 = vmov 2   ;;  %s1991_s20 = smov 127   ;;  %s3455_s0 = inlined_call_operand.vmem [shape: f32[2,128,128], index: 0, kind: input, shape index: {}]   ;;  %s3456_s1 = inlined_call_operand.vmem [shape: bf16[128,128], index: 1, kind: input, shape index: {}]   ;;  %s3457_s2 = inlined_call_operand.vmem [shape: f32[128,1], index: 2, kind: input, shape index: {}]   ;;  %s3458_s3 = inlined_call_operand.vmem [shape: f32[128,3], index: 3, kind: input, shape index: {}]   ;;  %s3459_s4 = inlined_call_operand.vmem [shape: f32[128,1], index: 4, kind: input, shape index: {}]   ;;  %s3460_s5 = inlined_call_operand.vmem [shape: bf16[128,128], index: 5, kind: input, shape index: {}]   ;;  %s3461_s6 = inlined_call_operand.vmem [shape: f32[128,1], index: 6, kind: input, shape index: {}]   ;;  %s3462_s7 = inlined_call_operand.hbm [shape: f32[2,128,128], index: 7, kind: output, shape index: {}]  }
   0x1   :  { %v2040_v0 = vld [vmem:[%s3455_s0] sm:$0xff]  ;;  %v86_v1 = vld [vmem:[%s3457_s2 + $0x10] sm:$0xff]  ;;  %v2048_v2 = vld [vmem:[%s3455_s0 + $0x8] sm:$0xff]  ;;  %1893 = vset.pattern.permute.xlu1 %v3463_v3  ;;  %1896 = vset.pattern.permute.xlu0 %v3468_v10 }
   0x2   :  { %397 = vrot.lane.b32.xlu0 %v2040_v0, %s1989_s30  ;;  %v148_v4 = vpack.c.bf16 %v2048_v2, %v2040_v0  ;;  %v2058_v5 = vld [vmem:[%s3455_s0 + $0x10] sm:$0xff]  ;;  %v2063_v6 = vld [vmem:[%s3455_s0 + $0x18] sm:$0xff]  ;;  %168 = vperm.xlu1 %1893, %v86_v1   ;;  %v2070_v8 = vld [vmem:[%s3455_s0 + $0x20] sm:$0xff] }
   0x3   :  { %v149_v7 = vpack.c.bf16 %v2063_v6, %v2058_v5  ;;  %v2075_v9 = vld [vmem:[%s3455_s0 + $0x28] sm:$0xff]  ;;  %v87_v11 = vld [vmem:[%s3457_s2 + $0x18] sm:$0xff]  ;;  %v2088_v13 = vld [vmem:[%s3455_s0 + $0x30] sm:$0xff] }
   0x4   :  { %1756 = vmatprep.subr.bf16.mxu0 %v148_v4  ;;  %v150_v12 = vpack.c.bf16 %v2075_v9, %v2070_v8  ;;  %v2093_v14 = vld [vmem:[%s3455_s0 + $0x38] sm:$0xff]  ;;  %v89_v15 = vld [vmem:[%s3457_s2 + $0x28] sm:$0xff]  ;;  %v2101_v16 = vld [vmem:[%s3456_s1] sm:$0xff]  }
   0x5   :  { %1757 = vmatpush3.bf16.msra.mxu0 %v148_v4  ;;  %v151_v17 = vpack.c.bf16 %v2093_v14, %v2088_v13  ;;  %v2110_v18 = vld [vmem:[%s3455_s0 + $0x40] sm:$0xff]  ;;  %v2115_v19 = vld [vmem:[%s3455_s0 + $0x48] sm:$0xff]  ;;  %1772 = vmatprep.mubr.bf16.mxu0 %v2101_v16  ;;  %v91_v20 = vld [vmem:[%s3457_s2 + $0x38] sm:$0xff] }
   0x6   :  { %401 = vrot.lane.b32.xlu0 %v2058_v5, %s1989_s30  ;;  %1758 = vmatprep.subr.bf16.mxu0 %v149_v7  ;;  %v152_v21 = vpack.c.bf16 %v2115_v19, %v2110_v18  ;;  %v2128_v22 = vld [vmem:[%s3455_s0 + $0x50] sm:$0xff]  ;;  %v2133_v23 = vld [vmem:[%s3455_s0 + $0x58] sm:$0xff]  ;;  %v93_v24 = vld [vmem:[%s3457_s2 + $0x48] sm:$0xff] }
   0x7   :  { %173 = vperm.xlu1 %1893, %v87_v11   ;;  %v153_v25 = vpack.c.bf16 %v2133_v23, %v2128_v22  ;;  %v2145_v26 = vld [vmem:[%s3455_s0 + $0x60] sm:$0xff]  ;;  %v2150_v27 = vld [vmem:[%s3455_s0 + $0x68] sm:$0xff]  ;;  %v95_v28 = vld [vmem:[%s3457_s2 + $0x58] sm:$0xff] }
   0x8   :  { %v154_v29 = vpack.c.bf16 %v2150_v27, %v2145_v26  ;;  %v2162_v30 = vld [vmem:[%s3455_s0 + $0x70] sm:$0xff]  ;;  %v2167_v31 = vld [vmem:[%s3455_s0 + $0x78] sm:$0xff]  ;;  %v97_v32 = vld [vmem:[%s3457_s2 + $0x68] sm:$0xff] }
   0x9   :  { %1759 = vmatpush3.bf16.msra.mxu0 %v149_v7  ;;  %v155_v33 = vpack.c.bf16 %v2167_v31, %v2162_v30  ;;  %v2179_v34 = vld [vmem:[%s3455_s0 + $0x80] sm:$0xff]  ;;  %v2184_v35 = vld [vmem:[%s3455_s0 + $0x88] sm:$0xff]  ;;  %v99_v36 = vld [vmem:[%s3457_s2 + $0x78] sm:$0xff] }
   0xa   :  { %405 = vrot.lane.b32.xlu0 %v2070_v8, %s1989_s30  ;;  %1760 = vmatprep.subr.bf16.mxu0 %v150_v12  ;;  %v2192_v37 = vld [vmem:[%s3455_s0 + $0x90] sm:$0xff]  ;;  %v2197_v38 = vld [vmem:[%s3455_s0 + $0x98] sm:$0xff]  ;;  %v2204_v39 = vld [vmem:[%s3456_s1 + $0x8] sm:$0xff]   ;;  %v1175_v40 = vpack.c.bf16 %v2184_v35, %v2179_v34 }
   0xb   :  { %183 = vperm.xlu1 %1893, %v89_v15   ;;  %v2211_v41 = vld [vmem:[%s3456_s1 + $0x10] sm:$0xff]   ;;  %v1176_v42 = vpack.c.bf16 %v2197_v38, %v2192_v37  ;;  %v2222_v43 = vld [vmem:[%s3455_s0 + $0xa0] sm:$0xff]  ;;  %v2227_v44 = vld [vmem:[%s3455_s0 + $0xa8] sm:$0xff] }
   0xd   :  { %1761 = vmatpush3.bf16.msra.mxu0 %v150_v12 }
   0xe   :  { %409 = vrot.lane.b32.xlu0 %v2088_v13, %s1989_s30  ;;  %1762 = vmatprep.subr.bf16.mxu0 %v151_v17 }
   0xf   :  { %193 = vperm.xlu1 %1893, %v91_v20  }
  0x11   :  { %1763 = vmatpush3.bf16.msra.mxu0 %v151_v17 }
  0x12   :  { %413 = vrot.lane.b32.xlu0 %v2110_v18, %s1989_s30  ;;  %1764 = vmatprep.subr.bf16.mxu0 %v152_v21 }
  0x13   :  { %203 = vperm.xlu1 %1893, %v93_v24  }
  0x15   :  { %1765 = vmatpush3.bf16.msra.mxu0 %v152_v21 }
  0x16   :  { %417 = vrot.lane.b32.xlu0 %v2128_v22, %s1989_s30  ;;  %1766 = vmatprep.subr.bf16.mxu0 %v153_v25 }
  0x17   :  { %213 = vperm.xlu1 %1893, %v95_v28  }
  0x19   :  { %1767 = vmatpush3.bf16.msra.mxu0 %v153_v25 }
  0x1a   :  { %421 = vrot.lane.b32.xlu0 %v2145_v26, %s1989_s30  ;;  %1768 = vmatprep.subr.bf16.mxu0 %v154_v29 }
  0x1b   :  { %223 = vperm.xlu1 %1893, %v97_v32  }
  0x1d   :  { %1769 = vmatpush3.bf16.msra.mxu0 %v154_v29 }
  0x1e   :  { %425 = vrot.lane.b32.xlu0 %v2162_v30, %s1989_s30  ;;  %1770 = vmatprep.subr.bf16.mxu0 %v155_v33 }
  0x1f   :  { %233 = vperm.xlu1 %1893, %v99_v36  }
  0x21   :  { %1771 = vmatpush3.bf16.msra.mxu0 %v155_v33 }
  0x22   :  { %445 = vrot.lane.b32.xlu0 %v2040_v0, %s1991_s20  ;;  %1820 = vmatprep.subr.bf16.mxu0 %v1175_v40 }
  0x23   :  { %399 = vrot.lane.b32.xlu1 %v2048_v2, %s1989_s30 }
  0x24   :  { %1773 = vmatmul.mubr.bf16.vlgmr.msra.gmra.mrb[0].mxu0 %v2204_v39 }
  0x25   :  { %12 = vsyncpa [#allocation3], 0  ;;  %1821 = vmatpush3.bf16.msra.mxu0 %v1175_v40  ;;  %1776 = vmatprep.mubr.bf16.mxu0 %v2211_v41  ;;  %v1177_v45 = vpack.c.bf16 %v2227_v44, %v2222_v43  ;;  %v2240_v46 = vld [vmem:[%s3455_s0 + $0xb0] sm:$0xff]  ;;  %v2245_v47 = vld [vmem:[%s3455_s0 + $0xb8] sm:$0xff]  ;;  %v3465_v12 = vmov 1  }
  0x26   :  { %449 = vrot.lane.b32.xlu0 %v2058_v5, %s1991_s20  ;;  %1822 = vmatprep.subr.bf16.mxu0 %v1176_v42  ;;  %3502 = vst [vmem:[#allocation5_spill] sm:$0xff] %v2245_v47  ;;  %v1924_v48 = vld [vmem:[%s3456_s1 + $0x18] sm:$0xff]   ;;  %v1925_v49 = vld [vmem:[%s3456_s1 + $0x20] sm:$0xff]   ;;  %v1178_v50 = vpack.c.bf16 %v2245_v47, %v2240_v46  ;;  %v2267_v52 = vld [vmem:[%s3455_s0 + $0xc8] sm:$0xff] }
  0x27   :  { %403 = vrot.lane.b32.xlu1 %v2063_v6, %s1989_s30  ;;  %v2262_v51 = vld [vmem:[%s3455_s0 + $0xc0] sm:$0xff]  ;;  %v2278_v54 = vld [vmem:[%s3455_s0 + $0xd0] sm:$0xff]  ;;  %v2283_v55 = vld [vmem:[%s3455_s0 + $0xd8] sm:$0xff] }
  0x28   :  { %v1179_v53 = vpack.c.bf16 %v2267_v52, %v2262_v51  ;;  %v1926_v56 = vld [vmem:[%s3456_s1 + $0x28] sm:$0xff]   ;;  %v1927_v57 = vld [vmem:[%s3456_s1 + $0x30] sm:$0xff]   ;;  %v1180_v58 = vpack.c.bf16 %v2283_v55, %v2278_v54  ;;  %v2300_v59 = vld [vmem:[%s3455_s0 + $0xe0] sm:$0xff] }
  0x29   :  { %1823 = vmatpush3.bf16.msra.mxu0 %v1176_v42  ;;  %v2305_v60 = vld [vmem:[%s3455_s0 + $0xe8] sm:$0xff]  ;;  %v2316_v62 = vld [vmem:[%s3455_s0 + $0xf0] sm:$0xff]  ;;  %v2321_v63 = vld [vmem:[%s3455_s0 + $0xf8] sm:$0xff] }
  0x2a   :  { %453 = vrot.lane.b32.xlu0 %v2070_v8, %s1991_s20  ;;  %1824 = vmatprep.subr.bf16.mxu0 %v1177_v45  ;;  %v1181_v61 = vpack.c.bf16 %v2305_v60, %v2300_v59  ;;  %3503 = vst [vmem:[#allocation6_spill] sm:$0xff] %v2316_v62  ;;  %v1928_v1 = vld [vmem:[%s3456_s1 + $0x38] sm:$0xff]   ;;  %v1182_v4 = vpack.c.bf16 %v2321_v63, %v2316_v62  ;;  %v69_v7 = vld [vmem:[%s3458_s3 + $0x8] sm:$0xff]  ;;  %v2352_v11 = vld [vmem:[%s3458_s3] sm:$0xff] }
  0x2b   :  { %407 = vrot.lane.b32.xlu1 %v2075_v9, %s1989_s30  ;;  %v71_v8 = vld [vmem:[%s3458_s3 + $0x18] sm:$0xff]  ;;  %v2366_v15 = vld [vmem:[%s3458_s3 + $0x28] sm:$0xff]  ;;  %v88_v21 = vld [vmem:[%s3457_s2 + $0x20] sm:$0xff] }
  0x2c   :  { %1777 = vmatmul.mubr.bf16.gmra.mrb[4].mxu0 %v1924_v48  ;;  %v2398_v17 = vld [vmem:[%s3458_s3 + $0x68] sm:$0xff]  ;;  %v92_v25 = vld [vmem:[%s3457_s2 + $0x40] sm:$0xff]  ;;  %v98_v33 = vld [vmem:[%s3457_s2 + $0x70] sm:$0xff] }
  0x2d   :  { %1825 = vmatpush3.bf16.msra.mxu0 %v1177_v45  ;;  %1780 = vmatprep.mubr.bf16.mxu0 %v1925_v49  ;;  %v85_v20 = vld [vmem:[%s3457_s2 + $0x8] sm:$0xff]  ;;  %v96_v29 = vld [vmem:[%s3457_s2 + $0x60] sm:$0xff] }
  0x2e   :  { %457 = vrot.lane.b32.xlu0 %v2088_v13, %s1991_s20  ;;  %1826 = vmatprep.subr.bf16.mxu0 %v1178_v50  ;;  %v70_v13 = vld [vmem:[%s3458_s3 + $0x10] sm:$0xff]  ;;  %v72_v45 = vld [vmem:[%s3458_s3 + $0x20] sm:$0xff] }
  0x2f   :  { %411 = vrot.lane.b32.xlu1 %v2093_v14, %s1989_s30 }
  0x31   :  { %1827 = vmatpush3.bf16.msra.mxu0 %v1178_v50  ;;  %v102_v50 = vld [vmem:[%s3459_s4 + $0x10] sm:$0xff] }
  0x32   :  { %461 = vrot.lane.b32.xlu0 %v2110_v18, %s1991_s20  ;;  %1828 = vmatprep.subr.bf16.mxu0 %v1179_v53  ;;  %v2404_v18 = vld [vmem:[%s3458_s3 + $0x78] sm:$0xff] }
  0x33   :  { %415 = vrot.lane.b32.xlu1 %v2115_v19, %s1989_s30 }
  0x34   :  { %1781 = vmatmul.mubr.bf16.gmra.mrb[8].mxu0 %v1926_v56 }
  0x35   :  { %1829 = vmatpush3.bf16.msra.mxu0 %v1179_v53  ;;  %1784 = vmatprep.mubr.bf16.mxu0 %v1927_v57 }
  0x36   :  { %465 = vrot.lane.b32.xlu0 %v2128_v22, %s1991_s20  ;;  %1830 = vmatprep.subr.bf16.mxu0 %v1180_v58 }
  0x37   :  { %419 = vrot.lane.b32.xlu1 %v2133_v23, %s1989_s30 }
  0x39   :  { %1831 = vmatpush3.bf16.msra.mxu0 %v1180_v58 }
  0x3a   :  { %469 = vrot.lane.b32.xlu0 %v2145_v26, %s1991_s20  ;;  %1832 = vmatprep.subr.bf16.mxu0 %v1181_v61 }
  0x3b   :  { %423 = vrot.lane.b32.xlu1 %v2150_v27, %s1989_s30 }
  0x3c   :  { %1785 = vmatmul.mubr.bf16.gmra.mrb[12].mxu0 %v1928_v1 }
  0x3d   :  { %1833 = vmatpush3.bf16.msra.mxu0 %v1181_v61  ;;  %1836 = vmatprep.mubr.bf16.mxu0 %v2101_v16  ;;  %v2390_v16 = vld [vmem:[%s3458_s3 + $0x58] sm:$0xff]  ;;  %v104_v61 = vld [vmem:[%s3459_s4 + $0x20] sm:$0xff] }
  0x3e   :  { %473 = vrot.lane.b32.xlu0 %v2162_v30, %s1991_s20  ;;  %1834 = vmatprep.subr.bf16.mxu0 %v1182_v4 }
  0x3f   :  { %427 = vrot.lane.b32.xlu1 %v2167_v31, %s1989_s30 }
  0x41   :  { %1835 = vmatpush3.bf16.msra.mxu0 %v1182_v4  ;;  %v103_v4 = vld [vmem:[%s3459_s4 + $0x18] sm:$0xff] }
  0x42   :  { %690 = vperm.xlu0 %1896, %v69_v7  }
  0x43   :  { %447 = vrot.lane.b32.xlu1 %v2048_v2, %s1991_s20 }
  0x44   :  { %1837 = vmatmul.mubr.bf16.vlgmr.msra.gmra.mrb[16].mxu0 %v2204_v39  ;;  %v101_v39 = vld [vmem:[%s3459_s4 + $0x8] sm:$0xff] }
  0x45   :  { %1840 = vmatprep.mubr.bf16.mxu0 %v2211_v41 }
  0x46   :  { %698 = vperm.xlu0 %1896, %v71_v8  }
  0x47   :  { %451 = vrot.lane.b32.xlu1 %v2063_v6, %s1991_s20 }
  0x4a   :  { %1900 = vset.pattern.permute.xlu0 %v3465_v12 }
  0x4b   :  { %455 = vrot.lane.b32.xlu1 %v2075_v9, %s1991_s20  ;;  %590 = vperm.xlu0 %1900, %v2352_v11   ;;  %v2374_v9 = vld [vmem:[%s3458_s3 + $0x38] sm:$0xff] }
  0x4c   :  { %1841 = vmatmul.mubr.bf16.gmra.mrb[20].mxu0 %v1924_v48 }
  0x4d   :  { %1844 = vmatprep.mubr.bf16.mxu0 %v1925_v49 }
  0x4f   :  { %459 = vrot.lane.b32.xlu1 %v2093_v14, %s1991_s20  ;;  %598 = vperm.xlu0 %1900, %v70_v13   ;;  %v2382_v14 = vld [vmem:[%s3458_s3 + $0x48] sm:$0xff] }
  0x53   :  { %463 = vrot.lane.b32.xlu1 %v2115_v19, %s1991_s20  ;;  %610 = vperm.xlu0 %1900, %v2366_v15   ;;  %v84_v19 = vld [vmem:[%s3457_s2] sm:$0xff] }
  0x54   :  { %1845 = vmatmul.mubr.bf16.gmra.mrb[24].mxu0 %v1926_v56 }
  0x55   :  { %1848 = vmatprep.mubr.bf16.mxu0 %v1927_v57 }
  0x57   :  { %467 = vrot.lane.b32.xlu1 %v2133_v23, %s1991_s20  ;;  %618 = vperm.xlu0 %1900, %v2374_v9   ;;  %v90_v23 = vld [vmem:[%s3457_s2 + $0x30] sm:$0xff] }
  0x5b   :  { %471 = vrot.lane.b32.xlu1 %v2150_v27, %s1991_s20  ;;  %626 = vperm.xlu0 %1900, %v2382_v14   ;;  %v94_v27 = vld [vmem:[%s3457_s2 + $0x50] sm:$0xff] }
  0x5c   :  { %1849 = vmatmul.mubr.bf16.gmra.mrb[28].mxu0 %v1928_v1 }
  0x5f   :  { %475 = vrot.lane.b32.xlu1 %v2167_v31, %s1991_s20  ;;  %634 = vperm.xlu0 %1900, %v2390_v16   ;;  %v100_v31 = vld [vmem:[%s3459_s4] sm:$0xff] }
  0x63   :  { %500 = vperm.xlu1 %1893, %v69_v7   ;;  %642 = vperm.xlu0 %1900, %v2398_v17  }
  0x67   :  { %1894 = vset.pattern.permute.xlu1 %v3465_v12  ;;  %650 = vperm.xlu0 %1900, %v2404_v18  }
  0x68   :  { %594 = vperm.xlu1 %1894, %v69_v7  }
  0x6b   :  { %1918 = vset.pattern.permute.xlu0 %v3463_v3 }
  0x6c   :  { %1895 = vset.pattern.permute.xlu1 %v3468_v10  ;;  %158 = vperm.xlu0 %1918, %v84_v19  }
  0x6d   :  { %686 = vperm.xlu1 %1895, %v2352_v11  }
  0x70   :  { %163 = vperm.xlu0 %1918, %v85_v20  }
  0x71   :  { %1897 = vset.pattern.permute.xlu1 %v3463_v3 }
  0x72   :  { %505 = vperm.xlu1 %1897, %v70_v13  }
  0x74   :  { %178 = vperm.xlu0 %1918, %v88_v21   ;;  %v2421_v22 = vpop.permute.xlu0 %397  ;;  %v108_v21 = vld [vmem:[%s3459_s4 + $0x40] sm:$0xff] }
  0x76   :  { %510 = vperm.xlu1 %1897, %v71_v8  }
  0x78   :  { %188 = vperm.xlu0 %1918, %v90_v23   ;;  %v2426_v24 = vpop.permute.xlu0 %401 }
  0x7a   :  { %1898 = vset.pattern.permute.xlu1 %v3465_v12 }
  0x7b   :  { %602 = vperm.xlu1 %1898, %v71_v8  }
  0x7c   :  { %198 = vperm.xlu0 %1918, %v92_v25   ;;  %v2432_v26 = vpop.permute.xlu0 %405 }
  0x7f   :  { %1899 = vset.pattern.permute.xlu1 %v3468_v10 }
  0x80   :  { %208 = vperm.xlu0 %1918, %v94_v27   ;;  %694 = vperm.xlu1 %1899, %v70_v13   ;;  %v2438_v28 = vpop.permute.xlu0 %409  ;;  %v74_v13 = vld [vmem:[%s3458_s3 + $0x30] sm:$0xff] }
  0x81   :  { %v2443_v30 = vpop.permute.xlu1 %168 }
  0x82   :  { %3504 = vst [vmem:[#allocation7_spill] sm:$0xff] %v2443_v30 }
  0x84   :  { %218 = vperm.xlu0 %1918, %v96_v29   ;;  %1901 = vset.pattern.permute.xlu1 %v3463_v3  ;;  %v2449_v32 = vpop.permute.xlu0 %413 }
  0x85   :  { %3505 = vst [vmem:[#allocation8_spill] sm:$0xff] %v2449_v32  ;;  %783 = vperm.xlu1 %1901, %v100_v31   ;;  %v110_v31 = vld [vmem:[%s3459_s4 + $0x50] sm:$0xff] }
  0x86   :  { %v2454_v36 = vpop.permute.xlu1 %173 }
  0x87   :  { %3506 = vst [vmem:[#allocation9_spill] sm:$0xff] %v2454_v36  ;;  %v3530_v36 = vmov 2  }
  0x88   :  { %228 = vperm.xlu0 %1918, %v98_v33   ;;  %v2459_v40 = vpop.permute.xlu0 %417 }
  0x89   :  { %3507 = vst [vmem:[#allocation10_spill] sm:$0xff] %v2459_v40  ;;  %788 = vperm.xlu1 %1901, %v101_v39   ;;  %v105_v39 = vld [vmem:[%s3459_s4 + $0x28] sm:$0xff] }
  0x8a   :  { %v2461_v41 = vpop.permute.xlu1 %183 }
  0x8b   :  { %3508 = vst [vmem:[#allocation11_spill] sm:$0xff] %v2461_v41 }
  0x8c   :  { %495 = vperm.xlu0 %1918, %v2352_v11   ;;  %v2464_v42 = vpop.permute.xlu0 %421  ;;  %v106_v11 = vld [vmem:[%s3459_s4 + $0x30] sm:$0xff] }
  0x8d   :  { %3509 = vst [vmem:[#allocation12_spill] sm:$0xff] %v2464_v42  ;;  %520 = vperm.xlu1 %1901, %v2366_v15  }
  0x8e   :  { %v2470_v48 = vpop.permute.xlu1 %193 }
  0x8f   :  { %3510 = vst [vmem:[#allocation13_spill] sm:$0xff] %v2470_v48 }
  0x90   :  { %515 = vperm.xlu0 %1918, %v72_v45   ;;  %v2472_v49 = vpop.permute.xlu0 %425 }
  0x91   :  { %3511 = vst [vmem:[#allocation14_spill] sm:$0xff] %v2472_v49  ;;  %1902 = vset.pattern.permute.xlu1 %v3465_v12 }
  0x92   :  { %v2478_v53 = vpop.permute.xlu1 %203  ;;  %606 = vperm.xlu1 %1902, %v72_v45  }
  0x93   :  { %3512 = vst [vmem:[#allocation15_spill] sm:$0xff] %v2478_v53 }
  0x94   :  { %793 = vperm.xlu0 %1918, %v102_v50   ;;  %v2480_v56 = vpop.permute.xlu0 %445 }
  0x96   :  { %v2482_v57 = vpop.permute.xlu1 %213  ;;  %1903 = vset.pattern.permute.xlu1 %v3468_v10 }
  0x97   :  { %3513 = vst [vmem:[#allocation16_spill] sm:$0xff] %v2482_v57  ;;  %702 = vperm.xlu1 %1903, %v72_v45  }
  0x98   :  { %530 = vperm.xlu0 %1918, %v2374_v9   ;;  %v2486_v58 = vpop.permute.xlu0 %449 }
  0x9a   :  { %v2491_v1 = vpop.permute.xlu1 %223 }
  0x9b   :  { %3514 = vst [vmem:[#allocation17_spill] sm:$0xff] %v2491_v1  ;;  %706 = vperm.xlu1 %1903, %v2366_v15   ;;  %v107_v1 = vld [vmem:[%s3459_s4 + $0x38] sm:$0xff] }
  0x9c   :  { %803 = vperm.xlu0 %1918, %v104_v61   ;;  %v2497_v7 = vpop.permute.xlu0 %453  ;;  %v76_v61 = vld [vmem:[%s3458_s3 + $0x40] sm:$0xff] }
  0x9e   :  { %v2499_v8 = vpop.permute.xlu1 %233 }
  0x9f   :  { %3515 = vst [vmem:[#allocation18_spill] sm:$0xff] %v2499_v8  ;;  %1904 = vset.pattern.permute.xlu1 %v3463_v3 }
  0xa0   :  { %540 = vperm.xlu0 %1918, %v2382_v14   ;;  %798 = vperm.xlu1 %1904, %v103_v4   ;;  %v2511_v19 = vpop.permute.xlu0 %457 }
  0xa2   :  { %v2509_v15 = vpop.permute.xlu1 %399 }
  0xa4   :  { %813 = vperm.xlu0 %1918, %v106_v11   ;;  %525 = vperm.xlu1 %1904, %v74_v13   ;;  %v2520_v23 = vpop.permute.xlu0 %461 }
  0xa5   :  { %3516 = vst [vmem:[#allocation19_spill] sm:$0xff] %v2520_v23 }
  0xa6   :  { %v2513_v20 = vpop.permute.xlu1 %403 }
  0xa8   :  { %550 = vperm.xlu0 %1918, %v2390_v16   ;;  %1905 = vset.pattern.permute.xlu1 %v3465_v12  ;;  %v2527_v29 = vpop.permute.xlu0 %465 }
  0xa9   :  { %614 = vperm.xlu1 %1905, %v74_v13   ;;  %3517 = vst [vmem:[#allocation20_spill] sm:$0xff] %v2527_v29 }
  0xaa   :  { %v2522_v25 = vpop.permute.xlu1 %407 }
  0xac   :  { %823 = vperm.xlu0 %1918, %v108_v21   ;;  %v2539_v45 = vpop.permute.xlu0 %469 }
  0xad   :  { %1906 = vset.pattern.permute.xlu1 %v3468_v10  ;;  %3519 = vst [vmem:[#allocation22_spill] sm:$0xff] %v2539_v45 }
  0xae   :  { %v2525_v27 = vpop.permute.xlu1 %411  ;;  %710 = vperm.xlu1 %1906, %v74_v13   ;;  %v115_v13 = vld [vmem:[%s3459_s4 + $0x78] sm:$0xff] }
  0xb0   :  { %560 = vperm.xlu0 %1918, %v2398_v17   ;;  %v2553_v11 = vpop.permute.xlu0 %473 }
  0xb1   :  { %3522 = vst [vmem:[#allocation25_spill] sm:$0xff] %v2553_v11 }
  0xb2   :  { %v2533_v33 = vpop.permute.xlu1 %415  ;;  %714 = vperm.xlu1 %1906, %v2374_v9   ;;  %v112_v9 = vld [vmem:[%s3459_s4 + $0x60] sm:$0xff] }
  0xb3   :  { %3518 = vst [vmem:[#allocation21_spill] sm:$0xff] %v2533_v33 }
  0xb4   :  { %833 = vperm.xlu0 %1918, %v110_v31  }
  0xb6   :  { %v2541_v50 = vpop.permute.xlu1 %419  ;;  %1907 = vset.pattern.permute.xlu1 %v3463_v3 }
  0xb7   :  { %3520 = vst [vmem:[#allocation23_spill] sm:$0xff] %v2541_v50  ;;  %808 = vperm.xlu1 %1907, %v105_v39  }
  0xb8   :  { %570 = vperm.xlu0 %1918, %v2404_v18  }
  0xba   :  { %v2551_v4 = vpop.permute.xlu1 %423 }
  0xbb   :  { %3521 = vst [vmem:[#allocation24_spill] sm:$0xff] %v2551_v4  ;;  %535 = vperm.xlu1 %1907, %v76_v61  }
  0xbc   :  { %843 = vperm.xlu0 %1918, %v112_v9  }
  0xbe   :  { %v2558_v21 = vpop.permute.xlu1 %427 }
  0xbf   :  { %3523 = vst [vmem:[#allocation26_spill] sm:$0xff] %v2558_v21  ;;  %1908 = vset.pattern.permute.xlu1 %v3465_v12 }
  0xc0   :  { %858 = vperm.xlu0 %1918, %v115_v13   ;;  %622 = vperm.xlu1 %1908, %v76_v61  }
  0xc1   :  { %v2561_v31 = vpop.permute.xlu0 %690 }
  0xc2   :  { %v2563_v39 = vpop.permute.xlu1 %447 }
  0xc4   :  { %1298 = vrot.lane.b32.xlu0 %v2184_v35, %s1989_s30  ;;  %1909 = vset.pattern.permute.xlu1 %v3468_v10 }
  0xc5   :  { %718 = vperm.xlu1 %1909, %v76_v61   ;;  %v2568_v9 = vpop.permute.xlu0 %698  ;;  %v3524_v61 = vmov 0  }
  0xc6   :  { %v2570_v3 = vpop.permute.xlu1 %451 }
  0xc8   :  { %1346 = vrot.lane.b32.xlu0 %v2184_v35, %s1991_s20  ;;  %v78_v35 = vld [vmem:[%s3458_s3 + $0x50] sm:$0xff] }
  0xc9   :  { %722 = vperm.xlu1 %1909, %v2382_v14  }
  0xca   :  { %v2575_v13 = vpop.permute.xlu1 %455  ;;  %v2577_v12 = vpop.permute.xlu0 %590 }
  0xcc   :  { %1302 = vrot.lane.b32.xlu0 %v2197_v38, %s1989_s30 }
  0xcd   :  { %1910 = vset.pattern.permute.xlu1 %v3524_v61 }
  0xce   :  { %v2585_v10 = vpop.permute.xlu1 %459  ;;  %818 = vperm.xlu1 %1910, %v107_v1   ;;  %v2587_v8 = vpop.permute.xlu0 %598  ;;  %v3527_v1 = vmov 1  }
  0xd0   :  { %1350 = vrot.lane.b32.xlu0 %v2197_v38, %s1991_s20 }
  0xd2   :  { %v2594_v14 = vpop.permute.xlu1 %463  ;;  %545 = vperm.xlu1 %1910, %v78_v35   ;;  %v2596_v53 = vpop.permute.xlu0 %610 }
  0xd3   :  { %3525 = vst [vmem:[#allocation27_spill] sm:$0xff] %v2594_v14 }
  0xd4   :  { %1306 = vrot.lane.b32.xlu0 %v2227_v44, %s1989_s30 }
  0xd6   :  { %v2600_v57 = vpop.permute.xlu1 %467  ;;  %1911 = vset.pattern.permute.xlu1 %v3527_v1  ;;  %v2603_v41 = vpop.permute.xlu0 %618 }
  0xd7   :  { %3526 = vst [vmem:[#allocation28_spill] sm:$0xff] %v2600_v57  ;;  %630 = vperm.xlu1 %1911, %v78_v35  }
  0xd8   :  { %1354 = vrot.lane.b32.xlu0 %v2227_v44, %s1991_s20 }
  0xda   :  { %v2607_v48 = vpop.permute.xlu1 %471  ;;  %v2609_v38 = vpop.permute.xlu0 %626 }
  0xdb   :  { %3528 = vst [vmem:[#allocation29_spill] sm:$0xff] %v2607_v48  ;;  %3529 = vst [vmem:[#allocation30_spill] sm:$0xff] %v2609_v38  ;;  %1912 = vset.pattern.permute.xlu1 %v3530_v36  ;;  %v109_v48 = vld [vmem:[%s3459_s4 + $0x48] sm:$0xff] }
  0xdc   :  { %1310 = vrot.lane.b32.xlu0 %v2245_v47, %s1989_s30  ;;  %726 = vperm.xlu1 %1912, %v78_v35  }
  0xde   :  { %v2614_v30 = vpop.permute.xlu1 %475  ;;  %v2616_v11 = vpop.permute.xlu0 %634 }
  0xdf   :  { %3531 = vst [vmem:[#allocation31_spill] sm:$0xff] %v2614_v30  ;;  %3532 = vst [vmem:[#allocation32_spill] sm:$0xff] %v2616_v11  ;;  %v28_v11 = vlaneseq }
  0xe0   :  { %1358 = vrot.lane.b32.xlu0 %v2245_v47, %s1991_s20  ;;  %730 = vperm.xlu1 %1912, %v2390_v16   ;;  %v80_v16 = vld [vmem:[%s3458_s3 + $0x60] sm:$0xff] }
  0xe2   :  { %v2621_v44 = vpop.permute.xlu1 %500  ;;  %v2623_v49 = vpop.permute.xlu0 %642 }
  0xe3   :  { %3533 = vst [vmem:[#allocation33_spill] sm:$0xff] %v2623_v49 }
  0xe4   :  { %1314 = vrot.lane.b32.xlu0 %v2267_v52, %s1989_s30  ;;  %1913 = vset.pattern.permute.xlu1 %v3524_v61 }
  0xe5   :  { %828 = vperm.xlu1 %1913, %v109_v48  }
  0xe6   :  { %v2631_v35 = vpop.permute.xlu0 %650 }
  0xe7   :  { %3534 = vst [vmem:[#allocation34_spill] sm:$0xff] %v2631_v35  ;;  %v2636_v30 = vpop.permute.xlu1 %594 }
  0xe8   :  { %3535 = vst [vmem:[#allocation35_spill] sm:$0xff] %v2636_v30  ;;  %1362 = vrot.lane.b32.xlu0 %v2267_v52, %s1991_s20  ;;  %v654_v32 = vmul.f32 %v2636_v30, %v2048_v2  ;;  %v653_v2 = vmul.f32 %v2577_v12, %v2040_v0  ;;  %v123_v0 = vld [vmem:[%s3461_s6 + $0x38] sm:$0xff] }
  0xe9   :  { %555 = vperm.xlu1 %1913, %v80_v16  }
  0xeb   :  { %v2640_v21 = vpop.permute.xlu0 %158 }
  0xec   :  { %1318 = vrot.lane.b32.xlu0 %v2283_v55, %s1989_s30  ;;  %v2644_v4 = vpop.permute.xlu1 %686 }
  0xed   :  { %1914 = vset.pattern.permute.xlu1 %v3527_v1 }
  0xee   :  { %638 = vperm.xlu1 %1914, %v80_v16  }
  0xef   :  { %v2647_v48 = vpop.permute.xlu0 %163 }
  0xf0   :  { %1366 = vrot.lane.b32.xlu0 %v2283_v55, %s1991_s20 }
  0xf1   :  { %v2651_v35 = vpop.permute.xlu1 %505 }
  0xf2   :  { %1915 = vset.pattern.permute.xlu1 %v3530_v36 }
  0xf3   :  { %v2654_v52 = vpop.permute.xlu0 %178  ;;  %734 = vperm.xlu1 %1915, %v80_v16   ;;  %v111_v16 = vld [vmem:[%s3459_s4 + $0x58] sm:$0xff] }
  0xf4   :  { %1322 = vrot.lane.b32.xlu0 %v2305_v60, %s1989_s30 }
  0xf5   :  { %v2658_v45 = vpop.permute.xlu1 %510 }
  0xf7   :  { %v2660_v42 = vpop.permute.xlu0 %188  ;;  %738 = vperm.xlu1 %1915, %v2398_v17   ;;  %v2663_v49 = vpop.f32.mrb[0].mxu0 }
  0xf8   :  { %3536 = vst [vmem:[#allocation36_spill] sm:$0xff] %v2663_v49  ;;  %1370 = vrot.lane.b32.xlu0 %v2305_v60, %s1991_s20  ;;  %v318_v55 = vpop.f32.mrb[1].mxu0 }
  0xf9   :  { %v2668_v57 = vadd.f32 %v318_v55, %v2640_v21  ;;  %v2670_v29 = vpop.f32.mrb[2].mxu0  ;;  %v82_v55 = vld [vmem:[%s3458_s3 + $0x70] sm:$0xff] }
  0xfa   :  { %3538 = vst [vmem:[#allocation38_spill] sm:$0xff] %v2670_v29  ;;  %v2675_v50 = vpop.permute.xlu1 %602  ;;  %v321_v40 = vpop.f32.mrb[3].mxu0 }
  0xfb   :  { %3537 = vst [vmem:[#allocation37_spill] sm:$0xff] %v2668_v57  ;;  %v2677_v17 = vpop.permute.xlu0 %198  ;;  %1916 = vset.pattern.permute.xlu1 %v3524_v61  ;;  %v2681_v60 = vadd.f32 %v321_v40, %v2647_v48  ;;  %v29_v57 = vand.u32 127, %v28_v11 }
  0xfc   :  { %1326 = vrot.lane.b32.xlu0 %v2321_v63, %s1989_s30  ;;  %838 = vperm.xlu1 %1916, %v111_v16   ;;  %v117_v16 = vld [vmem:[%s3461_s6 + $0x8] sm:$0xff] }
  0xfd   :  { %3539 = vst [vmem:[#allocation39_spill] sm:$0xff] %v2681_v60  ;;  %vm30_vm0 = vcmp.ne.s32.totalorder %v29_v57, 0  ;;  %vm33_vm1 = vcmp.ne.s32.totalorder %v29_v57, 127 }
  0xff   :  { %v2688_v29 = vpop.permute.xlu0 %208  ;;  %v2690_v49 = vpop.permute.xlu1 %694 }
 0x100   :  { %v1778_v47 = vpop.f32.mrb[4].mxu0  ;;  %1374 = vrot.lane.b32.xlu0 %v2321_v63, %s1991_s20  ;;  %565 = vperm.xlu1 %1916, %v82_v55   ;;  %v119_v63 = vld [vmem:[%s3461_s6 + $0x18] sm:$0xff] }
 0x101   :  { %v2695_v40 = vadd.f32 %v1778_v47, %v2660_v42  ;;  %v334_v60 = vpop.f32.mrb[5].mxu0 }
 0x102   :  { %v2701_v38 = vadd.f32 %v334_v60, %v2654_v52  ;;  %v2703_v11 = vpop.f32.mrb[6].mxu0  ;;  %v1993_v60 = vmov 0.0  }
 0x103   :  { %3540 = vst [vmem:[#allocation40_spill] sm:$0xff] %v2695_v40  ;;  %3542 = vst [vmem:[#allocation42_spill] sm:$0xff] %v2703_v11  ;;  %v2705_v14 = vpop.f32.mrb[7].mxu0  ;;  %v2707_v23 = vpop.permute.xlu0 %218 }
 0x104   :  { %3541 = vst [vmem:[#allocation41_spill] sm:$0xff] %v2701_v38  ;;  %3543 = vst [vmem:[#allocation43_spill] sm:$0xff] %v2705_v14  ;;  %892 = vperm.xlu0 %1918, %v117_v16   ;;  %1917 = vset.pattern.permute.xlu1 %v3527_v1  ;;  %v2710_v47 = vpop.permute.xlu1 %783  ;;  %v2715_v38 = vsel %vm30_vm0, 1.0, %v1993_v60  ;;  %v2719_v14 = vsel %vm33_vm1, 1.0, %v1993_v60 }
 0x105   :  { %646 = vperm.xlu1 %1917, %v82_v55   ;;  %v430_v33 = vmul.f32 %v2715_v38, %v2509_v15  ;;  %v477_v15 = vmul.f32 %v2719_v14, %v2480_v56 }
 0x107   :  { %v2717_v40 = vpop.permute.xlu0 %228  ;;  %v1782_v11 = vpop.f32.mrb[8].mxu0  ;;  %v749_v56 = vmul.f32 %v2644_v4, %v477_v15 }
 0x108   :  { %v2722_v16 = vadd.f32 %v1782_v11, %v2688_v29  ;;  %902 = vperm.xlu0 %1918, %v119_v63   ;;  %v2724_v1 = vpop.permute.xlu1 %788  ;;  %v350_v57 = vpop.f32.mrb[9].mxu0  ;;  %v121_v11 = vld [vmem:[%s3461_s6 + $0x28] sm:$0xff]  ;;  %v429_v63 = vmul.f32 %v2715_v38, %v2421_v22 }
 0x109   :  { %v2731_v62 = vadd.f32 %v350_v57, %v2677_v17  ;;  %1919 = vset.pattern.permute.xlu1 %v3530_v36  ;;  %v2734_v60 = vpop.f32.mrb[10].mxu0  ;;  %v478_v36 = vmul.f32 %v2719_v14, %v2563_v39 }
 0x10a   :  { %3544 = vst [vmem:[#allocation44_spill] sm:$0xff] %v2722_v16  ;;  %3546 = vst [vmem:[#allocation46_spill] sm:$0xff] %v2734_v60  ;;  %742 = vperm.xlu1 %1919, %v82_v55   ;;  %v2745_v57 = vpop.f32.mrb[11].mxu0 }
 0x10b   :  { %3545 = vst [vmem:[#allocation45_spill] sm:$0xff] %v2731_v62  ;;  %3547 = vst [vmem:[#allocation47_spill] sm:$0xff] %v2745_v57  ;;  %v574_v62 = vmul.f32 %v2621_v44, %v430_v33  ;;  %v2750_v16 = vpop.permute.xlu0 %495  ;;  %v750_v39 = vmul.f32 %v2561_v31, %v478_v36 }
 0x10c   :  { %v573_v60 = vmul.f32 %v2750_v16, %v429_v63  ;;  %912 = vperm.xlu0 %1918, %v121_v11   ;;  %v2753_v22 = vpop.permute.xlu1 %520 }
 0x10d   :  { %v670_v30 = vadd.f32 %v654_v32, %v574_v62  ;;  %v113_v62 = vld [vmem:[%s3459_s4 + $0x68] sm:$0xff] }
 0x10e   :  { %v669_v55 = vadd.f32 %v653_v2, %v573_v60  ;;  %746 = vperm.xlu1 %1919, %v2404_v18   ;;  %v125_v2 = vld [vmem:[%s3461_s6 + $0x48] sm:$0xff] }
 0x10f   :  { %v2761_v33 = vpop.permute.xlu0 %515  ;;  %v1786_v57 = vpop.f32.mrb[12].mxu0 }
 0x110   :  { %v2764_v63 = vadd.f32 %v1786_v57, %v2717_v40  ;;  %922 = vperm.xlu0 %1918, %v123_v0   ;;  %v366_v11 = vpop.f32.mrb[13].mxu0  ;;  %v765_v32 = vadd.f32 %v749_v56, %v669_v55  ;;  %v766_v57 = vadd.f32 %v750_v39, %v670_v30  ;;  %v127_v30 = vld [vmem:[%s3461_s6 + $0x58] sm:$0xff]  ;;  %v432_v39 = vmul.f32 %v2715_v38, %v2513_v20 }
 0x111   :  { %v2770_v15 = vadd.f32 %v366_v11, %v2707_v23  ;;  %v2772_v60 = vpop.permute.xlu1 %606  ;;  %v2774_v18 = vpop.f32.mrb[14].mxu0  ;;  %v114_v11 = vld [vmem:[%s3459_s4 + $0x70] sm:$0xff] }
 0x112   :  { %3548 = vst [vmem:[#allocation48_spill] sm:$0xff] %v2764_v63  ;;  %3550 = vst [vmem:[#allocation50_spill] sm:$0xff] %v2772_v60  ;;  %1920 = vset.pattern.permute.xlu1 %v3524_v61  ;;  %v2780_v36 = vpop.f32.mrb[15].mxu0  ;;  %v861_v56 = vadd.f32 %v2710_v47, %v765_v32  ;;  %v862_v55 = vadd.f32 %v2724_v1, %v766_v57  ;;  %v431_v61 = vmul.f32 %v2715_v38, %v2426_v24 }
 0x113   :  { %3549 = vst [vmem:[#allocation49_spill] sm:$0xff] %v2770_v15  ;;  %3551 = vst [vmem:[#allocation51_spill] sm:$0xff] %v2774_v18  ;;  %v2782_v0 = vpop.permute.xlu0 %793  ;;  %848 = vperm.xlu1 %1920, %v113_v62   ;;  %v656_v62 = vmul.f32 %v2675_v50, %v2063_v6  ;;  %v480_v57 = vmul.f32 %v2719_v14, %v2570_v3  ;;  %v655_v24 = vmul.f32 %v2587_v8, %v2058_v5 }
 0x114   :  { %3552 = vst [vmem:[#allocation52_spill] sm:$0xff] %v2780_v36  ;;  %932 = vperm.xlu0 %1918, %v125_v2   ;;  %v877_v15 = vpack.c.bf16 %v862_v55, %v861_v56  ;;  %v479_v2 = vmul.f32 %v2719_v14, %v2486_v58  ;;  %v575_v20 = vmul.f32 %v2651_v35, %v431_v61 }
 0x115   :  { %v576_v6 = vmul.f32 %v2658_v45, %v432_v39  ;;  %v2837_v39 = vld [vmem:[%s3460_s5] sm:$0xff]  }
 0x116   :  { %v2798_v32 = vpop.permute.xlu1 %702  ;;  %1788 = vmatprep.subr.bf16.mxu1 %v877_v15  ;;  %v751_v36 = vmul.f32 %v2690_v49, %v479_v2  ;;  %3559 = vst [vmem:[#allocation59_spill] sm:$0xff] %v2837_v39  ;;  %1804 = vmatprep.mubr.bf16.mxu1 %v2837_v39 }
 0x117   :  { %3553 = vst [vmem:[#allocation53_spill] sm:$0xff] %v2798_v32  ;;  %v2804_v56 = vpop.permute.xlu0 %530  ;;  %853 = vperm.xlu1 %1920, %v114_v11   ;;  %v2806_v55 = vpop.f32.mrb[16].mxu0  ;;  %1789 = vmatpush3.bf16.msra.mxu1 %v877_v15  ;;  %v129_v11 = vld [vmem:[%s3461_s6 + $0x68] sm:$0xff]  ;;  %v671_v15 = vadd.f32 %v655_v24, %v575_v20 }
 0x118   :  { %3554 = vst [vmem:[#allocation54_spill] sm:$0xff] %v2806_v55  ;;  %942 = vperm.xlu0 %1918, %v127_v30   ;;  %v1217_v63 = vpop.f32.mrb[17].mxu0  ;;  %v672_v55 = vadd.f32 %v656_v62, %v576_v6  ;;  %v131_v30 = vld [vmem:[%s3461_s6 + $0x78] sm:$0xff] }
 0x119   :  { %v2813_v58 = vadd.f32 %v1217_v63, %v2640_v21  ;;  %v2815_v3 = vpop.f32.mrb[18].mxu0  ;;  %v752_v63 = vmul.f32 %v2568_v9, %v480_v57  ;;  %v767_v62 = vadd.f32 %v751_v36, %v671_v15 }
 0x11a   :  { %3556 = vst [vmem:[#allocation56_spill] sm:$0xff] %v2815_v3  ;;  %v2821_v5 = vpop.permute.xlu1 %706  ;;  %v1220_v61 = vpop.f32.mrb[19].mxu0 }
 0x11b   :  { %3555 = vst [vmem:[#allocation55_spill] sm:$0xff] %v2813_v58  ;;  %v2823_v18 = vpop.permute.xlu0 %803  ;;  %1296 = vrot.lane.b32.xlu1 %v2179_v34, %s1989_s30  ;;  %v2828_v21 = vadd.f32 %v1220_v61, %v2647_v48  ;;  %v768_v2 = vadd.f32 %v752_v63, %v672_v55  ;;  %v863_v57 = vadd.f32 %v2782_v0, %v767_v62 }
 0x11c   :  { %3557 = vst [vmem:[#allocation57_spill] sm:$0xff] %v2823_v18  ;;  %952 = vperm.xlu0 %1918, %v129_v11  }
 0x11d   :  { %3558 = vst [vmem:[#allocation58_spill] sm:$0xff] %v2828_v21 }
 0x11f   :  { %v2839_v6 = vpop.permute.xlu0 %540  ;;  %1344 = vrot.lane.b32.xlu1 %v2179_v34, %s1991_s20  ;;  %v2843_v48 = vpop.permute.xlu1 %798 }
 0x120   :  { %3560 = vst [vmem:[#allocation60_spill] sm:$0xff] %v2843_v48  ;;  %v864_v24 = vadd.f32 %v2843_v48, %v768_v2  ;;  %v1842_v20 = vpop.f32.mrb[20].mxu0  ;;  %962 = vperm.xlu0 %1918, %v131_v30  }
 0x121   :  { %v2849_v11 = vadd.f32 %v1842_v20, %v2660_v42  ;;  %v1233_v36 = vpop.f32.mrb[21].mxu0 }
 0x122   :  { %v2852_v55 = vadd.f32 %v1233_v36, %v2654_v52  ;;  %v2854_v61 = vpop.f32.mrb[22].mxu0  ;;  %v878_v34 = vpack.c.bf16 %v864_v24, %v863_v57 }
 0x123   :  { %3561 = vst [vmem:[#allocation61_spill] sm:$0xff] %v2849_v11  ;;  %3563 = vst [vmem:[#allocation63_spill] sm:$0xff] %v2854_v61  ;;  %v2856_v63 = vpop.f32.mrb[23].mxu0  ;;  %v2858_v15 = vpop.permute.xlu0 %813  ;;  %1300 = vrot.lane.b32.xlu1 %v2192_v37, %s1989_s30 }
 0x124   :  { %3562 = vst [vmem:[#allocation62_spill] sm:$0xff] %v2852_v55  ;;  %3564 = vst [vmem:[#allocation64_spill] sm:$0xff] %v2856_v63  ;;  %v2862_v62 = vpop.permute.xlu1 %525  ;;  %1790 = vmatprep.subr.bf16.mxu1 %v878_v34 }
 0x125   :  { %3565 = vst [vmem:[#allocation65_spill] sm:$0xff] %v2858_v15  ;;  %3566 = vst [vmem:[#allocation66_spill] sm:$0xff] %v2862_v62  ;;  %1791 = vmatpush3.bf16.msra.mxu1 %v878_v34 }
 0x127   :  { %v2864_v42 = vpop.permute.xlu0 %550  ;;  %1348 = vrot.lane.b32.xlu1 %v2192_v37, %s1991_s20  ;;  %v1846_v52 = vpop.f32.mrb[24].mxu0  ;;  %v433_v37 = vmul.f32 %v2715_v38, %v2432_v26  ;;  %v1938_v26 = vld [vmem:[%s3455_s0 + $0x28] sm:$0xff] }
 0x128   :  { %v2869_v30 = vadd.f32 %v1846_v52, %v2688_v29  ;;  %v2871_v2 = vpop.permute.xlu1 %614  ;;  %v1249_v57 = vpop.f32.mrb[25].mxu0  ;;  %v434_v29 = vmul.f32 %v2715_v38, %v2522_v25  ;;  %v481_v52 = vmul.f32 %v2719_v14, %v2497_v7  ;;  %v658_v25 = vmul.f32 %v1938_v26, %v2596_v53 }
 0x129   :  { %3568 = vst [vmem:[#allocation68_spill] sm:$0xff] %v2871_v2  ;;  %v2874_v24 = vadd.f32 %v1249_v57, %v2677_v17  ;;  %v2876_v20 = vpop.f32.mrb[26].mxu0  ;;  %v1937_v17 = vld [vmem:[%s3455_s0 + $0x20] sm:$0xff]  ;;  %v577_v7 = vmul.f32 %v2761_v33, %v433_v37 }
 0x12a   :  { %3567 = vst [vmem:[#allocation67_spill] sm:$0xff] %v2869_v30  ;;  %3570 = vst [vmem:[#allocation70_spill] sm:$0xff] %v2876_v20  ;;  %v2878_v36 = vpop.f32.mrb[27].mxu0  ;;  %v657_v57 = vmul.f32 %v1937_v17, %v2772_v60  ;;  %v482_v30 = vmul.f32 %v2719_v14, %v2575_v13  ;;  %v753_v20 = vmul.f32 %v2798_v32, %v481_v52  ;;  %v3588_v60 = vld [vmem:[#allocation5_spill] sm:$0xff] }
 0x12b   :  { %3569 = vst [vmem:[#allocation69_spill] sm:$0xff] %v2874_v24  ;;  %3571 = vst [vmem:[#allocation71_spill] sm:$0xff] %v2878_v36  ;;  %v2880_v34 = vpop.permute.xlu0 %823  ;;  %1304 = vrot.lane.b32.xlu1 %v2222_v43, %s1989_s30  ;;  %v578_v36 = vmul.f32 %v2753_v22, %v434_v29  ;;  %v1415_v48 = vmul.f32 %v3588_v60, %v2603_v41 }
 0x12c   :  { %v673_v63 = vadd.f32 %v657_v57, %v577_v7  ;;  %v754_v61 = vmul.f32 %v2821_v5, %v482_v30 }
 0x12d   :  { %v2894_v24 = vpop.permute.xlu1 %710  ;;  %v674_v21 = vadd.f32 %v658_v25, %v578_v36  ;;  %v483_v25 = vmul.f32 %v2719_v14, %v2511_v19 }
 0x12e   :  { %3572 = vst [vmem:[#allocation72_spill] sm:$0xff] %v2894_v24  ;;  %v769_v58 = vadd.f32 %v753_v20, %v673_v63  ;;  %v436_v20 = vmul.f32 %v2715_v38, %v2525_v27 }
 0x12f   :  { %v2905_v55 = vpop.permute.xlu0 %560  ;;  %1352 = vrot.lane.b32.xlu1 %v2222_v43, %s1991_s20  ;;  %v1850_v17 = vpop.f32.mrb[28].mxu0 }
 0x130   :  { %v2910_v13 = vadd.f32 %v1850_v17, %v2717_v40  ;;  %v1265_v11 = vpop.f32.mrb[29].mxu0  ;;  %v770_v40 = vadd.f32 %v754_v61, %v674_v21  ;;  %v865_v30 = vadd.f32 %v2823_v18, %v769_v58 }
 0x131   :  { %v2914_v26 = vadd.f32 %v1265_v11, %v2707_v23  ;;  %v2916_v29 = vpop.permute.xlu1 %714  ;;  %v2918_v37 = vpop.f32.mrb[30].mxu0 }
 0x132   :  { %3573 = vst [vmem:[#allocation73_spill] sm:$0xff] %v2910_v13  ;;  %3575 = vst [vmem:[#allocation75_spill] sm:$0xff] %v2918_v37  ;;  %v2920_v52 = vpop.f32.mrb[31].mxu0 }
 0x133   :  { %3574 = vst [vmem:[#allocation74_spill] sm:$0xff] %v2914_v26  ;;  %3576 = vst [vmem:[#allocation76_spill] sm:$0xff] %v2920_v52  ;;  %v2922_v43 = vpop.permute.xlu0 %833  ;;  %1308 = vrot.lane.b32.xlu1 %v2240_v46, %s1989_s30 }
 0x134   :  { %3577 = vst [vmem:[#allocation77_spill] sm:$0xff] %v2922_v43 }
 0x136   :  { %v2926_v57 = vpop.permute.xlu1 %808 }
 0x137   :  { %3578 = vst [vmem:[#allocation78_spill] sm:$0xff] %v2926_v57  ;;  %v866_v23 = vadd.f32 %v2926_v57, %v770_v40  ;;  %v2930_v11 = vpop.permute.xlu0 %570  ;;  %1356 = vrot.lane.b32.xlu1 %v2240_v46, %s1991_s20  ;;  %v435_v46 = vmul.f32 %v2715_v38, %v2438_v28  ;;  %v1940_v28 = vld [vmem:[%s3455_s0 + $0x38] sm:$0xff] }
 0x138   :  { %v660_v27 = vmul.f32 %v1940_v28, %v2603_v41  ;;  %v122_v41 = vld [vmem:[%s3461_s6 + $0x30] sm:$0xff] }
 0x139   :  { %v879_v7 = vpack.c.bf16 %v866_v23, %v865_v30  ;;  %v484_v30 = vmul.f32 %v2719_v14, %v2585_v10  ;;  %v580_v23 = vmul.f32 %v2804_v56, %v436_v20  ;;  %v579_v19 = vmul.f32 %v2862_v62, %v435_v46 }
 0x13a   :  { %v2934_v36 = vpop.permute.xlu1 %535 }
 0x13b   :  { %v2936_v63 = vpop.permute.xlu0 %843  ;;  %1312 = vrot.lane.b32.xlu1 %v2262_v51, %s1989_s30  ;;  %1792 = vmatprep.subr.bf16.mxu1 %v879_v7  ;;  %v756_v10 = vmul.f32 %v2916_v29, %v484_v30  ;;  %v676_v52 = vadd.f32 %v660_v27, %v580_v23  ;;  %v3581_v27 = vld [vmem:[#allocation6_spill] sm:$0xff] }
 0x13c   :  { %1793 = vmatpush3.bf16.msra.mxu1 %v879_v7  ;;  %v755_v7 = vmul.f32 %v2894_v24, %v483_v25 }
 0x13d   :  { %v772_v46 = vadd.f32 %v756_v10, %v676_v52  ;;  %v3584_v10 = vld [vmem:[#allocation19_spill] sm:$0xff] }
 0x13f   :  { %v2940_v21 = vpop.permute.xlu0 %858  ;;  %1360 = vrot.lane.b32.xlu1 %v2262_v51, %s1991_s20  ;;  %v2944_v58 = vpop.permute.xlu1 %622  ;;  %v1939_v51 = vld [vmem:[%s3455_s0 + $0x30] sm:$0xff] }
 0x140   :  { %3579 = vst [vmem:[#allocation79_spill] sm:$0xff] %v2944_v58  ;;  %v659_v17 = vmul.f32 %v1939_v51, %v2871_v2  ;;  %v3587_v2 = vld [vmem:[#allocation30_spill] sm:$0xff] }
 0x142   :  { %v675_v51 = vadd.f32 %v659_v17, %v579_v19 }
 0x143   :  { %v2946_v61 = vpop.permute.xlu0 %1298  ;;  %1316 = vrot.lane.b32.xlu1 %v2278_v54, %s1989_s30 }
 0x144   :  { %v2960_v40 = vpop.permute.xlu1 %718  ;;  %v771_v37 = vadd.f32 %v755_v7, %v675_v51  ;;  %v3583_v7 = vld [vmem:[#allocation21_spill] sm:$0xff] }
 0x145   :  { %3580 = vst [vmem:[#allocation80_spill] sm:$0xff] %v2960_v40  ;;  %v438_v51 = vmul.f32 %v2715_v38, %v3583_v7  ;;  %v118_v7 = vld [vmem:[%s3461_s6 + $0x10] sm:$0xff] }
 0x146   :  { %v867_v25 = vadd.f32 %v2858_v15, %v771_v37  ;;  %v3582_v37 = vld [vmem:[#allocation8_spill] sm:$0xff]  ;;  %v3586_v15 = vld [vmem:[#allocation27_spill] sm:$0xff] }
 0x147   :  { %v2971_v26 = vpop.permute.xlu0 %1346  ;;  %1364 = vrot.lane.b32.xlu1 %v2278_v54, %s1991_s20  ;;  %v437_v19 = vmul.f32 %v2715_v38, %v3582_v37  ;;  %v486_v39 = vmul.f32 %v2719_v14, %v3586_v15 }
 0x148   :  { %v2976_v13 = vpop.permute.xlu1 %722 }
 0x14b   :  { %v2978_v3 = vpop.permute.xlu0 %1302  ;;  %1320 = vrot.lane.b32.xlu1 %v2300_v59, %s1989_s30 }
 0x14d   :  { %v819_v20 = vpop.permute.xlu1 %818 }
 0x14e   :  { %v868_v28 = vadd.f32 %v819_v20, %v772_v46  ;;  %v485_v46 = vmul.f32 %v2719_v14, %v3584_v10  ;;  %v1942_v10 = vld [vmem:[%s3455_s0 + $0x48] sm:$0xff] }
 0x14f   :  { %v2983_v24 = vpop.permute.xlu0 %1350  ;;  %1368 = vrot.lane.b32.xlu1 %v2300_v59, %s1991_s20  ;;  %v116_v59 = vld [vmem:[%s3461_s6] sm:$0xff]  ;;  %v662_v57 = vmul.f32 %v1942_v10, %v3587_v2 }
 0x150   :  { %v880_v54 = vpack.c.bf16 %v868_v28, %v867_v25  ;;  %v1941_v25 = vld [vmem:[%s3455_s0 + $0x40] sm:$0xff] }
 0x151   :  { %v2987_v17 = vpop.permute.xlu1 %545  ;;  %v661_v28 = vmul.f32 %v1941_v25, %v2944_v58  ;;  %v582_v25 = vmul.f32 %v2839_v6, %v438_v51  ;;  %v757_v58 = vmul.f32 %v2960_v40, %v485_v46 }
 0x152   :  { %1794 = vmatprep.subr.bf16.mxu1 %v880_v54 }
 0x153   :  { %v2989_v30 = vpop.permute.xlu0 %1306  ;;  %1324 = vrot.lane.b32.xlu1 %v3581_v27, %s1989_s30  ;;  %1795 = vmatpush3.bf16.msra.mxu1 %v880_v54  ;;  %v678_v51 = vadd.f32 %v662_v57, %v582_v25 }
 0x156   :  { %v2993_v52 = vpop.permute.xlu1 %630 }
 0x157   :  { %v2995_v23 = vpop.permute.xlu0 %1354  ;;  %1372 = vrot.lane.b32.xlu1 %v3581_v27, %s1991_s20 }
 0x15b   :  { %v1311_v54 = vpop.permute.xlu0 %1310  ;;  %887 = vperm.xlu1 %1920, %v116_v59   ;;  %v3012_v27 = vpop.permute.xlu1 %726  ;;  %v581_v59 = vmul.f32 %v2934_v36, %v437_v19  ;;  %v120_v19 = vld [vmem:[%s3461_s6 + $0x20] sm:$0xff] }
 0x15c   :  { %3585 = vst [vmem:[#allocation6_spill] sm:$0xff] %v3012_v27  ;;  %v1335_v37 = vmul.f32 %v2715_v38, %v1311_v54  ;;  %v758_v54 = vmul.f32 %v2976_v13, %v486_v39 }
 0x15d   :  { %v677_v18 = vadd.f32 %v661_v28, %v581_v59 }
 0x15e   :  { %v1399_v15 = vmul.f32 %v1335_v37, %v2804_v56  ;;  %v774_v39 = vadd.f32 %v758_v54, %v678_v51  ;;  %v124_v54 = vld [vmem:[%s3461_s6 + $0x40] sm:$0xff] }
 0x15f   :  { %v1359_v62 = vpop.permute.xlu0 %1358  ;;  %897 = vperm.xlu1 %1920, %v118_v7   ;;  %v3029_v32 = vpop.permute.xlu1 %730  ;;  %v773_v46 = vadd.f32 %v757_v58, %v677_v18  ;;  %v1943_v58 = vld [vmem:[%s3455_s0 + $0xc8] sm:$0xff] }
 0x160   :  { %v1383_v10 = vmul.f32 %v2719_v14, %v1359_v62  ;;  %v1431_v40 = vadd.f32 %v1415_v48, %v1399_v15 }
 0x161   :  { %v869_v60 = vadd.f32 %v2880_v34, %v773_v46 }
 0x162   :  { %v1447_v56 = vmul.f32 %v1383_v10, %v2916_v29 }
 0x163   :  { %v1315_v28 = vpop.permute.xlu0 %1314  ;;  %907 = vperm.xlu1 %1920, %v120_v19  }
 0x164   :  { %v1463_v37 = vadd.f32 %v1447_v56, %v1431_v40  ;;  %v1337_v7 = vmul.f32 %v2715_v38, %v1315_v28  ;;  %v829_v59 = vpop.permute.xlu1 %828  ;;  %v1417_v40 = vmul.f32 %v1943_v58, %v3587_v2  ;;  %v126_v2 = vld [vmem:[%s3461_s6 + $0x50] sm:$0xff] }
 0x165   :  { %v870_v62 = vadd.f32 %v829_v59, %v774_v39 }
 0x166   :  { %v1401_v57 = vmul.f32 %v1337_v7, %v2839_v6  ;;  %v3044_v18 = vadd.f32 %v1463_v37, %v819_v20  ;;  %v3592_v37 = vld [vmem:[#allocation32_spill] sm:$0xff] }
 0x167   :  { %v881_v48 = vpack.c.bf16 %v870_v62, %v869_v60  ;;  %v1363_v29 = vpop.permute.xlu0 %1362  ;;  %917 = vperm.xlu1 %1920, %v122_v41   ;;  %v128_v60 = vld [vmem:[%s3461_s6 + $0x60] sm:$0xff]  ;;  %v3593_v62 = vld [vmem:[#allocation10_spill] sm:$0xff] }
 0x168   :  { %v1385_v25 = vmul.f32 %v2719_v14, %v1363_v29  ;;  %v3051_v15 = vpop.permute.xlu1 %555  ;;  %v1433_v6 = vadd.f32 %v1417_v40, %v1401_v57  ;;  %v439_v57 = vmul.f32 %v2715_v38, %v3593_v62  ;;  %v3595_v29 = vld [vmem:[#allocation20_spill] sm:$0xff]  ;;  %v1945_v40 = vld [vmem:[%s3455_s0 + $0x50] sm:$0xff] }
 0x169   :  { %3589 = vst [vmem:[#allocation8_spill] sm:$0xff] %v3051_v15  ;;  %1796 = vmatprep.subr.bf16.mxu1 %v881_v48  ;;  %v487_v58 = vmul.f32 %v2719_v14, %v3595_v29 }
 0x16a   :  { %v1449_v20 = vmul.f32 %v1385_v25, %v2976_v13  ;;  %1797 = vmatpush3.bf16.msra.mxu1 %v881_v48  ;;  %v1944_v13 = vld [vmem:[%s3455_s0 + $0xd8] sm:$0xff]  ;;  %v3594_v48 = vld [vmem:[#allocation23_spill] sm:$0xff]  ;;  %v663_v25 = vmul.f32 %v1945_v40, %v2993_v52  ;;  %v3598_v40 = vld [vmem:[#allocation33_spill] sm:$0xff] }
 0x16b   :  { %v1319_v10 = vpop.permute.xlu0 %1318  ;;  %927 = vperm.xlu1 %1920, %v124_v54   ;;  %v1419_v7 = vmul.f32 %v1944_v13, %v3592_v37  ;;  %v759_v13 = vmul.f32 %v3012_v27, %v487_v58  ;;  %v1947_v58 = vld [vmem:[%s3455_s0 + $0xe8] sm:$0xff] }
 0x16c   :  { %v1465_v19 = vadd.f32 %v1449_v20, %v1433_v6  ;;  %v1339_v51 = vmul.f32 %v2715_v38, %v1319_v10  ;;  %v3597_v10 = vld [vmem:[#allocation28_spill] sm:$0xff] }
 0x16d   :  { %v3061_v46 = vpop.permute.xlu1 %638 }
 0x16e   :  { %3590 = vst [vmem:[#allocation21_spill] sm:$0xff] %v3061_v46  ;;  %v1403_v56 = vmul.f32 %v1339_v51, %v2864_v42  ;;  %v3064_v28 = vadd.f32 %v1465_v19, %v829_v59  ;;  %v440_v59 = vmul.f32 %v2715_v38, %v3594_v48  ;;  %v488_v19 = vmul.f32 %v2719_v14, %v3597_v10 }
 0x16f   :  { %v1367_v39 = vpop.permute.xlu0 %1366  ;;  %937 = vperm.xlu1 %1920, %v126_v2  }
 0x170   :  { %3591 = vst [vmem:[#allocation19_spill] sm:$0xff] %v3064_v28  ;;  %v1387_v41 = vmul.f32 %v2719_v14, %v1367_v39  ;;  %v1435_v54 = vadd.f32 %v1419_v7, %v1403_v56  ;;  %v584_v51 = vmul.f32 %v2864_v42, %v440_v59  ;;  %v583_v39 = vmul.f32 %v2987_v17, %v439_v57  ;;  %v130_v56 = vld [vmem:[%s3461_s6 + $0x70] sm:$0xff] }
 0x172   :  { %v1451_v6 = vmul.f32 %v1387_v41, %v3029_v32  ;;  %v3085_v20 = vpop.permute.xlu1 %734  ;;  %v1946_v41 = vld [vmem:[%s3455_s0 + $0x58] sm:$0xff]  ;;  %v679_v42 = vadd.f32 %v663_v25, %v583_v39 }
 0x173   :  { %3596 = vst [vmem:[#allocation27_spill] sm:$0xff] %v3085_v20  ;;  %v1323_v2 = vpop.permute.xlu0 %1322  ;;  %947 = vperm.xlu1 %1920, %v128_v60   ;;  %v664_v48 = vmul.f32 %v1946_v41, %v3592_v37  ;;  %v760_v60 = vmul.f32 %v3029_v32, %v488_v19 }
 0x174   :  { %v1341_v62 = vmul.f32 %v2715_v38, %v1323_v2  ;;  %v1467_v7 = vadd.f32 %v1451_v6, %v1435_v54  ;;  %v1421_v54 = vmul.f32 %v1947_v58, %v3598_v40  ;;  %v775_v10 = vadd.f32 %v759_v13, %v679_v42 }
 0x175   :  { %v680_v6 = vadd.f32 %v664_v48, %v584_v51  ;;  %v3600_v48 = vld [vmem:[#allocation12_spill] sm:$0xff] }
 0x176   :  { %v1405_v57 = vmul.f32 %v1341_v62, %v2905_v55  ;;  %v739_v59 = vpop.permute.xlu1 %738  ;;  %v871_v32 = vadd.f32 %v2922_v43, %v775_v10  ;;  %v441_v42 = vmul.f32 %v2715_v38, %v3600_v48 }
 0x177   :  { %v1371_v29 = vpop.permute.xlu0 %1370  ;;  %957 = vperm.xlu1 %1920, %v130_v56   ;;  %v776_v25 = vadd.f32 %v760_v60, %v680_v6  ;;  %v3601_v60 = vld [vmem:[#allocation22_spill] sm:$0xff] }
 0x178   :  { %v1389_v2 = vmul.f32 %v2719_v14, %v1371_v29  ;;  %v1437_v27 = vadd.f32 %v1421_v54, %v1405_v57  ;;  %v489_v57 = vmul.f32 %v2719_v14, %v3601_v60  ;;  %v3602_v29 = vld [vmem:[#allocation24_spill] sm:$0xff]  ;;  %v3605_v60 = vld [vmem:[#allocation14_spill] sm:$0xff] }
 0x179   :  { %v442_v54 = vmul.f32 %v2715_v38, %v3602_v29 }
 0x17a   :  { %v1453_v37 = vmul.f32 %v1389_v2, %v739_v59  ;;  %v585_v2 = vmul.f32 %v3051_v15, %v441_v42  ;;  %v1949_v42 = vld [vmem:[%s3455_s0 + $0xf8] sm:$0xff] }
 0x17b   :  { %v839_v39 = vpop.permute.xlu1 %838  ;;  %v1327_v58 = vpop.permute.xlu0 %1326  ;;  %v586_v48 = vmul.f32 %v2905_v55, %v442_v54 }
 0x17c   :  { %v872_v19 = vadd.f32 %v839_v39, %v776_v25  ;;  %v3108_v62 = vadd.f32 %v1467_v7, %v839_v39  ;;  %v1469_v56 = vadd.f32 %v1453_v37, %v1437_v27  ;;  %v1343_v13 = vmul.f32 %v2715_v38, %v1327_v58  ;;  %v1948_v27 = vld [vmem:[%s3455_s0 + $0x60] sm:$0xff] }
 0x17d   :  { %v665_v7 = vmul.f32 %v1948_v27, %v3061_v46  ;;  %v761_v37 = vmul.f32 %v3085_v20, %v489_v57  ;;  %v443_v27 = vmul.f32 %v2715_v38, %v3605_v60  ;;  %v3606_v57 = vld [vmem:[#allocation34_spill] sm:$0xff]  ;;  %v3607_v20 = vld [vmem:[#allocation31_spill] sm:$0xff] }
 0x17e   :  { %3599 = vst [vmem:[#allocation30_spill] sm:$0xff] %v3108_v62  ;;  %v882_v41 = vpack.c.bf16 %v872_v19, %v871_v32  ;;  %v1407_v25 = vmul.f32 %v1343_v13, %v2930_v11  ;;  %v3603_v32 = vld [vmem:[#allocation26_spill] sm:$0xff]  ;;  %v1423_v29 = vmul.f32 %v1949_v42, %v3606_v57  ;;  %v3608_v62 = vld [vmem:[#allocation25_spill] sm:$0xff] }
 0x17f   :  { %v3110_v28 = vpop.permute.xlu1 %565  ;;  %v1375_v6 = vpop.permute.xlu0 %1374  ;;  %v444_v19 = vmul.f32 %v2715_v38, %v3603_v32  ;;  %v681_v13 = vadd.f32 %v665_v7, %v585_v2  ;;  %v1950_v32 = vld [vmem:[%s3455_s0 + $0x68] sm:$0xff]  ;;  %v491_v46 = vmul.f32 %v2719_v14, %v3608_v62 }
 0x180   :  { %1798 = vmatprep.subr.bf16.mxu1 %v882_v41  ;;  %v1391_v39 = vmul.f32 %v2719_v14, %v1375_v6  ;;  %v492_v6 = vmul.f32 %v2719_v14, %v3607_v20  ;;  %v1439_v15 = vadd.f32 %v1423_v29, %v1407_v25  ;;  %v1951_v20 = vld [vmem:[%s3455_s0 + $0x78] sm:$0xff] }
 0x181   :  { %1799 = vmatpush3.bf16.msra.mxu1 %v882_v41  ;;  %v3604_v41 = vld [vmem:[#allocation29_spill] sm:$0xff]  ;;  %v588_v55 = vmul.f32 %v2930_v11, %v444_v19  ;;  %v777_v43 = vadd.f32 %v761_v37, %v681_v13  ;;  %v668_v7 = vmul.f32 %v1951_v20, %v3606_v57  ;;  %v587_v37 = vmul.f32 %v3110_v28, %v443_v27 }
 0x182   :  { %v490_v58 = vmul.f32 %v2719_v14, %v3604_v41  ;;  %v666_v41 = vmul.f32 %v1950_v32, %v3598_v40  ;;  %v1952_v40 = vld [vmem:[%s3455_s0 + $0x70] sm:$0xff] }
 0x183   :  { %v684_v62 = vadd.f32 %v668_v7, %v588_v55  ;;  %v873_v29 = vadd.f32 %v2936_v63, %v777_v43  ;;  %v1377_v43 = vmul.f32 %v2719_v14, %v2971_v26  ;;  %v1953_v26 = vld [vmem:[%s3455_s0 + $0x88] sm:$0xff] }
 0x184   :  { %v3112_v51 = vpop.permute.xlu1 %646  ;;  %v762_v54 = vmul.f32 %v739_v59, %v490_v58  ;;  %v682_v2 = vadd.f32 %v666_v41, %v586_v48 }
 0x185   :  { %v667_v11 = vmul.f32 %v1952_v40, %v3112_v51  ;;  %v1441_v7 = vmul.f32 %v1377_v43, %v2561_v31 }
 0x187   :  { %v683_v57 = vadd.f32 %v667_v11, %v587_v37 }
 0x189   :  { %v3125_v10 = vpop.permute.xlu1 %742 }
 0x18a   :  { %v763_v25 = vmul.f32 %v3125_v10, %v491_v46 }
 0x18c   :  { %v779_v20 = vadd.f32 %v763_v25, %v683_v57  ;;  %v1331_v25 = vmul.f32 %v2715_v38, %v2978_v3  ;;  %v3209_v3 = vld [vmem:[%s3460_s5 + $0x18] sm:$0xff]  }
 0x18d   :  { %v747_v60 = vpop.permute.xlu1 %746 }
 0x18e   :  { %v1455_v42 = vmul.f32 %v1391_v39, %v747_v60  ;;  %v764_v59 = vmul.f32 %v747_v60, %v492_v6  ;;  %v778_v39 = vadd.f32 %v762_v54, %v682_v2  ;;  %v3184_v60 = vld [vmem:[%s3460_s5 + $0x10] sm:$0xff]  }
 0x190   :  { %v3159_v19 = vadd.f32 %v1455_v42, %v1439_v15  ;;  %v780_v48 = vadd.f32 %v764_v59, %v684_v62  ;;  %v1329_v15 = vmul.f32 %v2715_v38, %v2946_v61  ;;  %v3179_v61 = vld [vmem:[%s3460_s5 + $0x8] sm:$0xff]   ;;  %v3609_v42 = vld [vmem:[#allocation35_spill] sm:$0xff]  ;;  %v1954_v59 = vld [vmem:[%s3455_s0 + $0x80] sm:$0xff] }
 0x191   :  { %v1408_v62 = vmul.f32 %v1954_v59, %v2577_v12  ;;  %v1395_v12 = vmul.f32 %v1331_v25, %v2658_v45  ;;  %v3610_v59 = vld [vmem:[#allocation60_spill] sm:$0xff]  ;;  %v1958_v25 = vld [vmem:[%s3455_s0 + $0xa0] sm:$0xff] }
 0x192   :  { %v849_v58 = vpop.permute.xlu1 %848  ;;  %v876_v46 = vadd.f32 %v2940_v21, %v780_v48 }
 0x193   :  { %v874_v13 = vadd.f32 %v849_v58, %v778_v39  ;;  %v3164_v32 = vadd.f32 %v1469_v56, %v849_v58  ;;  %v1393_v56 = vmul.f32 %v1329_v15, %v2621_v44  ;;  %v1409_v44 = vmul.f32 %v1953_v26, %v3609_v42 }
 0x195   :  { %v883_v41 = vpack.c.bf16 %v874_v13, %v873_v29  ;;  %v1425_v37 = vadd.f32 %v1409_v44, %v1393_v56  ;;  %v3241_v44 = vld [vmem:[%s3460_s5 + $0x28] sm:$0xff]  }
 0x196   :  { %v3166_v40 = vpop.permute.xlu1 %853 }
 0x197   :  { %v875_v27 = vadd.f32 %v3166_v40, %v779_v20  ;;  %1800 = vmatprep.subr.bf16.mxu1 %v883_v41  ;;  %v1457_v31 = vadd.f32 %v1441_v7, %v1425_v37 }
 0x198   :  { %1801 = vmatpush3.bf16.msra.mxu1 %v883_v41  ;;  %v1955_v41 = vld [vmem:[%s3455_s0 + $0x98] sm:$0xff] }
 0x199   :  { %v884_v6 = vpack.c.bf16 %v876_v46, %v875_v27  ;;  %v1473_v27 = vadd.f32 %v1457_v31, %v2724_v1  ;;  %v1956_v46 = vld [vmem:[%s3455_s0 + $0x90] sm:$0xff] }
 0x19a   :  { %v1297_v55 = vpop.permute.xlu1 %1296  ;;  %v1410_v43 = vmul.f32 %v1956_v46, %v2587_v8 }
 0x19b   :  { %v1328_v54 = vmul.f32 %v2715_v38, %v1297_v55  ;;  %1802 = vmatprep.subr.bf16.mxu1 %v884_v6  ;;  %v1333_v55 = vmul.f32 %v2715_v38, %v2989_v30 }
 0x19c   :  { %1803 = vmatpush3.bf16.msra.mxu1 %v884_v6 }
 0x19d   :  { %v1392_v2 = vmul.f32 %v1328_v54, %v2750_v16  ;;  %v1379_v16 = vmul.f32 %v2719_v14, %v2983_v24  ;;  %v1411_v24 = vmul.f32 %v1955_v41, %v2675_v50  ;;  %v1397_v26 = vmul.f32 %v1333_v55, %v2753_v22  ;;  %v3613_v41 = vld [vmem:[#allocation66_spill] sm:$0xff] }
 0x19e   :  { %v1345_v11 = vpop.permute.xlu1 %1344 }
 0x19f   :  { %v1376_v39 = vmul.f32 %v2719_v14, %v1345_v11  ;;  %1805 = vmatmul.mubr.bf16.vlgmr.msra.gmra.mrb[0].mxu1 %v3179_v61  ;;  %v1424_v58 = vadd.f32 %v1408_v62, %v1392_v2  ;;  %v1443_v45 = vmul.f32 %v1379_v16, %v2568_v9  ;;  %v1427_v6 = vadd.f32 %v1411_v24, %v1395_v12 }
 0x1a0   :  { %1808 = vmatprep.mubr.bf16.mxu1 %v3184_v60 }
 0x1a1   :  { %v1440_v29 = vmul.f32 %v1376_v39, %v2644_v4  ;;  %v3218_v4 = vld [vmem:[%s3460_s5 + $0x20] sm:$0xff]   ;;  %v3611_v39 = vld [vmem:[#allocation50_spill] sm:$0xff] }
 0x1a2   :  { %v1301_v57 = vpop.permute.xlu1 %1300 }
 0x1a3   :  { %v1456_v48 = vadd.f32 %v1440_v29, %v1424_v58  ;;  %v1330_v13 = vmul.f32 %v2715_v38, %v1301_v57 }
 0x1a5   :  { %v1394_v20 = vmul.f32 %v1330_v13, %v2651_v35  ;;  %v1472_v15 = vadd.f32 %v1456_v48, %v2710_v47  ;;  %v1459_v35 = vadd.f32 %v1443_v45, %v1427_v6  ;;  %v1381_v47 = vmul.f32 %v2719_v14, %v2995_v23  ;;  %v1957_v23 = vld [vmem:[%s3455_s0 + $0xa8] sm:$0xff]  ;;  %v3268_v13 = vld [vmem:[%s3460_s5 + $0x38] sm:$0xff]   ;;  %v3614_v45 = vld [vmem:[#allocation57_spill] sm:$0xff] }
 0x1a6   :  { %v1349_v50 = vpop.permute.xlu1 %1348  ;;  %v1413_v7 = vmul.f32 %v1957_v23, %v2596_v53  ;;  %v1412_v53 = vmul.f32 %v1958_v25, %v3611_v39  ;;  %v3621_v25 = vld [vmem:[#allocation80_spill] sm:$0xff] }
 0x1a7   :  { %v1378_v56 = vmul.f32 %v2719_v14, %v1349_v50  ;;  %1809 = vmatmul.mubr.bf16.gmra.mrb[4].mxu1 %v3209_v3  ;;  %v1488_v9 = vpack.c.bf16 %v1473_v27, %v1472_v15  ;;  %v1426_v1 = vadd.f32 %v1410_v43, %v1394_v20  ;;  %v1445_v22 = vmul.f32 %v1381_v47, %v2821_v5  ;;  %v3615_v15 = vld [vmem:[#allocation78_spill] sm:$0xff]  ;;  %v1959_v43 = vld [vmem:[%s3455_s0 + $0xb0] sm:$0xff]  ;;  %v3616_v50 = vld [vmem:[#allocation68_spill] sm:$0xff] }
 0x1a8   :  { %1812 = vmatprep.mubr.bf16.mxu1 %v3218_v4  ;;  %v1475_v62 = vadd.f32 %v1459_v35, %v3610_v59  ;;  %v1429_v31 = vadd.f32 %v1413_v7, %v1397_v26  ;;  %v1414_v6 = vmul.f32 %v1959_v43, %v3616_v50  ;;  %v3618_v47 = vld [vmem:[#allocation72_spill] sm:$0xff]  ;;  %v3626_v43 = vld [vmem:[#allocation21_spill] sm:$0xff] }
 0x1a9   :  { %v1442_v54 = vmul.f32 %v1378_v56, %v2690_v49  ;;  %1852 = vmatprep.subr.bf16.mxu1 %v1488_v9  ;;  %v3250_v49 = vld [vmem:[%s3460_s5 + $0x30] sm:$0xff]  }
 0x1aa   :  { %v1305_v8 = vpop.permute.xlu1 %1304  ;;  %1853 = vmatpush3.bf16.msra.mxu1 %v1488_v9  ;;  %v3617_v9 = vld [vmem:[#allocation59_spill] sm:$0xff] }
 0x1ab   :  { %v1458_v30 = vadd.f32 %v1442_v54, %v1426_v1  ;;  %v1332_v42 = vmul.f32 %v2715_v38, %v1305_v8 }
 0x1ad   :  { %v1396_v2 = vmul.f32 %v1332_v42, %v2761_v33  ;;  %v1474_v11 = vadd.f32 %v1458_v30, %v2782_v0  ;;  %v1461_v33 = vadd.f32 %v1445_v22, %v1429_v31  ;;  %v3612_v0 = vld [vmem:[#allocation53_spill] sm:$0xff] }
 0x1ae   :  { %v1353_v37 = vpop.permute.xlu1 %1352  ;;  %v3619_v42 = vld [vmem:[#allocation65_spill] sm:$0xff] }
 0x1af   :  { %v1380_v16 = vmul.f32 %v2719_v14, %v1353_v37  ;;  %1813 = vmatmul.mubr.bf16.gmra.mrb[8].mxu1 %v3241_v44  ;;  %v1489_v58 = vpack.c.bf16 %v1475_v62, %v1474_v11  ;;  %v1428_v5 = vadd.f32 %v1412_v53, %v1396_v2  ;;  %v1477_v27 = vadd.f32 %v1461_v33, %v3615_v15  ;;  %v1960_v22 = vld [vmem:[%s3455_s0 + $0xc0] sm:$0xff]  ;;  %v3620_v2 = vld [vmem:[#allocation79_spill] sm:$0xff] }
 0x1b0   :  { %1816 = vmatprep.mubr.bf16.mxu1 %v3250_v49  ;;  %v1416_v11 = vmul.f32 %v1960_v22, %v3620_v2  ;;  %v3625_v15 = vld [vmem:[#allocation77_spill] sm:$0xff] }
 0x1b1   :  { %v1444_v29 = vmul.f32 %v1380_v16, %v3612_v0  ;;  %1854 = vmatprep.subr.bf16.mxu1 %v1489_v58 }
 0x1b2   :  { %v1309_v57 = vpop.permute.xlu1 %1308  ;;  %1855 = vmatpush3.bf16.msra.mxu1 %v1489_v58 }
 0x1b3   :  { %v1460_v12 = vadd.f32 %v1444_v29, %v1428_v5  ;;  %v1334_v48 = vmul.f32 %v2715_v38, %v1309_v57  ;;  %v1961_v5 = vld [vmem:[%s3455_s0 + $0xd0] sm:$0xff] }
 0x1b4   :  { %v3622_v29 = vld [vmem:[#allocation19_spill] sm:$0xff] }
 0x1b5   :  { %v1398_v24 = vmul.f32 %v1334_v48, %v3613_v41  ;;  %v1476_v20 = vadd.f32 %v1460_v12, %v3614_v45  ;;  %v3623_v48 = vld [vmem:[#allocation6_spill] sm:$0xff]  ;;  %v3624_v45 = vld [vmem:[#allocation8_spill] sm:$0xff] }
 0x1b6   :  { %v1357_v46 = vpop.permute.xlu1 %1356 }
 0x1b7   :  { %v1382_v55 = vmul.f32 %v2719_v14, %v1357_v46  ;;  %1817 = vmatmul.mubr.bf16.gmra.mrb[12].mxu1 %v3268_v13  ;;  %v1490_v56 = vpack.c.bf16 %v1477_v27, %v1476_v20  ;;  %v1430_v35 = vadd.f32 %v1414_v6, %v1398_v24 }
 0x1b8   :  { %1868 = vmatprep.mubr.bf16.mxu1 %v3617_v9 }
 0x1b9   :  { %v1446_v1 = vmul.f32 %v1382_v55, %v3618_v47  ;;  %1856 = vmatprep.subr.bf16.mxu1 %v1490_v56  ;;  %v3627_v55 = vld [vmem:[#allocation30_spill] sm:$0xff] }
 0x1ba   :  { %v1313_v54 = vpop.permute.xlu1 %1312  ;;  %1857 = vmatpush3.bf16.msra.mxu1 %v1490_v56 }
 0x1bb   :  { %v1462_v8 = vadd.f32 %v1446_v1, %v1430_v35  ;;  %v1336_v26 = vmul.f32 %v2715_v38, %v1313_v54  ;;  %v3628_v35 = vld [vmem:[#allocation27_spill] sm:$0xff] }
 0x1bd   :  { %v1400_v30 = vmul.f32 %v1336_v26, %v2934_v36  ;;  %v1478_v23 = vadd.f32 %v1462_v8, %v3619_v42 }
 0x1be   :  { %v1361_v7 = vpop.permute.xlu1 %1360 }
 0x1bf   :  { %v1384_v59 = vmul.f32 %v2719_v14, %v1361_v7  ;;  %v1491_v62 = vpack.c.bf16 %v3044_v18, %v1478_v23  ;;  %v1432_v37 = vadd.f32 %v1416_v11, %v1400_v30  ;;  %v1418_v18 = vmul.f32 %v1961_v5, %v2993_v52  ;;  %v1962_v52 = vld [vmem:[%s3455_s0 + $0xe0] sm:$0xff]  ;;  %v1963_v23 = vld [vmem:[%s3455_s0 + $0xf0] sm:$0xff]  ;;  %s1994_s0 = smov [#allocation2]  }
 0x1c0   :  { %v1420_v50 = vmul.f32 %v1962_v52, %v3626_v43  ;;  %v1422_v7 = vmul.f32 %v1963_v23, %v3112_v51  ;;  %v3633_v5 = vld [vmem:[#allocation37_spill] sm:$0xff]  ;;  %v3636_v43 = vld [vmem:[#allocation42_spill] sm:$0xff]  ;;  %s1647_s16 = sshll.u32 %s1994_s0, 4  ;;  %s1648_s16 = int_to_ptr.vmem [resolvable:$true] %s1647_s16 }
 0x1c1   :  { %v1448_v39 = vmul.f32 %v1384_v59, %v3621_v25  ;;  %1858 = vmatprep.subr.bf16.mxu1 %v1491_v62  ;;  %v3635_v52 = vld [vmem:[#allocation13_spill] sm:$0xff]  ;;  %s1964_s17 = scalar_lea.vmem %s1648_s16, 4096  ;;  %p1969_p1 = scmp.lt.s32.totalorder %s1648_s16, %s1648_s16 }
 0x1c2   :  { %v1317_v53 = vpop.permute.xlu1 %1316  ;;  %1859 = vmatpush3.bf16.msra.mxu1 %v1491_v62  ;;  %v3640_v23 = vld [vmem:[#allocation41_spill] sm:$0xff]  ;;  %p1965_p0 = scmp.ne.s32.totalorder %s1648_s16, %s1964_s17  ;;  %p1970_p2 = scmp.lt.s32.totalorder %s1964_s17, %s1964_s17 }
 0x1c3   :  { %v1464_v36 = vadd.f32 %v1448_v39, %v1432_v37  ;;  %v1338_v31 = vmul.f32 %v2715_v38, %v1317_v53 }
 0x1c4   :  { %p1971_p3 = por %p1970_p2, %p1969_p1 }
 0x1c5   :  { %v1402_v16 = vmul.f32 %v1338_v31, %v2987_v17  ;;  %v1480_v58 = vadd.f32 %v1464_v36, %v2880_v34 }
 0x1c6   :  { %v1365_v33 = vpop.permute.xlu1 %1364  ;;  %p1972_p4 = pnand %p1971_p3, %p1965_p0 }
 0x1c7   :  { %v1386_v0 = vmul.f32 %v2719_v14, %v1365_v33  ;;  %v1492_v57 = vpack.c.bf16 %v3622_v29, %v1480_v58  ;;  %v1434_v12 = vadd.f32 %v1418_v18, %v1402_v16  ;;  %v381_v18 = vmax.f32 %v3633_v5, 0.0 }
 0x1c9   :  { %v1450_v41 = vmul.f32 %v1386_v0, %v3623_v48  ;;  %1860 = vmatprep.subr.bf16.mxu1 %v1492_v57 }
 0x1ca   :  { %v1321_v24 = vpop.permute.xlu1 %1320  ;;  %1861 = vmatpush3.bf16.msra.mxu1 %v1492_v57 }
 0x1cb   :  { %v1466_v17 = vadd.f32 %v1450_v41, %v1434_v12  ;;  %v1340_v34 = vmul.f32 %v2715_v38, %v1321_v24  ;;  %v3634_v41 = vld [vmem:[#allocation39_spill] sm:$0xff] }
 0x1cc   :  { %v382_v24 = vmax.f32 %v3634_v41, 0.0 }
 0x1cd   :  { %v1404_v20 = vmul.f32 %v1340_v34, %v3624_v45  ;;  %v1482_v27 = vadd.f32 %v1466_v17, %v3625_v15 }
 0x1ce   :  { %v1369_v46 = vpop.permute.xlu1 %1368 }
 0x1cf   :  { %v1388_v6 = vmul.f32 %v2719_v14, %v1369_v46  ;;  %v1493_v56 = vpack.c.bf16 %v3627_v55, %v1482_v27  ;;  %v1436_v9 = vadd.f32 %v1420_v50, %v1404_v20  ;;  %v346_v50 = vadd.f32 %v3636_v43, %v3635_v52 }
 0x1d1   :  { %v1452_v47 = vmul.f32 %v1388_v6, %v3628_v35  ;;  %1862 = vmatprep.subr.bf16.mxu1 %v1493_v56 }
 0x1d2   :  { %v1325_v1 = vpop.permute.xlu1 %1324  ;;  %1863 = vmatpush3.bf16.msra.mxu1 %v1493_v56  ;;  %v3637_v56 = vld [vmem:[#allocation11_spill] sm:$0xff] }
 0x1d3   :  { %v1468_v54 = vadd.f32 %v1452_v47, %v1436_v9  ;;  %v1342_v8 = vmul.f32 %v2715_v38, %v1325_v1  ;;  %v3638_v9 = vld [vmem:[#allocation43_spill] sm:$0xff] }
 0x1d4   :  { %v338_v35 = vadd.f32 %v3638_v9, %v3637_v56 }
 0x1d5   :  { %v1406_v26 = vmul.f32 %v1342_v8, %v3110_v28  ;;  %v1484_v30 = vadd.f32 %v1468_v54, %v2936_v63  ;;  %v1487_v63 = vadd.f32 %v3159_v19, %v2940_v21  ;;  %v3333_v21 = vpop.permute.xlu0 %892  ;;  %v3639_v54 = vld [vmem:[#allocation40_spill] sm:$0xff] }
 0x1d6   :  { %v1373_v42 = vpop.permute.xlu1 %1372  ;;  %v387_v8 = vmax.f32 %v3639_v54, 0.0 }
 0x1d7   :  { %v1390_v22 = vmul.f32 %v2719_v14, %v1373_v42  ;;  %v1494_v2 = vpack.c.bf16 %v3164_v32, %v1484_v30  ;;  %v1438_v11 = vadd.f32 %v1422_v7, %v1406_v26  ;;  %v385_v7 = vmax.f32 %v3640_v23, 0.0 }
 0x1d9   :  { %v1454_v59 = vmul.f32 %v1390_v22, %v3125_v10  ;;  %1864 = vmatprep.subr.bf16.mxu1 %v1494_v2  ;;  %v3337_v10 = vpop.permute.xlu0 %902 }
 0x1da   :  { %1865 = vmatpush3.bf16.msra.mxu1 %v1494_v2  ;;  %v3331_v14 = vpop.permute.xlu1 %887 }
 0x1db   :  { %v1470_v38 = vadd.f32 %v1454_v59, %v1438_v11  ;;  %v388_v59 = vmax.f32 %v346_v50, 0.0 }
 0x1dd   :  { %v1486_v28 = vadd.f32 %v1470_v38, %v3166_v40  ;;  %v3341_v32 = vpop.permute.xlu0 %912  ;;  %v3629_v40 = vld [vmem:[#allocation7_spill] sm:$0xff] }
 0x1de   :  { %v3335_v51 = vpop.permute.xlu1 %897 }
 0x1df   :  { %v1495_v62 = vpack.c.bf16 %v1487_v63, %v1486_v28  ;;  %v386_v28 = vmax.f32 %v338_v35, 0.0 }
 0x1e1   :  { %1866 = vmatprep.subr.bf16.mxu1 %v1495_v62  ;;  %v3350_v39 = vpop.permute.xlu0 %922 }
 0x1e2   :  { %1867 = vmatpush3.bf16.msra.mxu1 %v1495_v62  ;;  %v3339_v19 = vpop.permute.xlu1 %907 }
 0x1e5   :  { %1869 = vmatmul.mubr.bf16.vlgmr.msra.gmra.mrb[16].mxu1 %v3179_v61  ;;  %v3630_v61 = vld [vmem:[#allocation36_spill] sm:$0xff]  ;;  %v3359_v15 = vpop.permute.xlu0 %932 }
 0x1e6   :  { %1872 = vmatprep.mubr.bf16.mxu1 %v3184_v60  ;;  %v327_v60 = vadd.f32 %v3630_v61, %v3629_v40 }
 0x1e8   :  { %v383_v31 = vmax.f32 %v327_v60, 0.0 }
 0x1e9   :  { %v3373_v62 = vpop.permute.xlu0 %942 }
 0x1ed   :  { %1873 = vmatmul.mubr.bf16.gmra.mrb[20].mxu1 %v3209_v3  ;;  %v3345_v3 = vpop.permute.xlu1 %917 }
 0x1ee   :  { %1876 = vmatprep.mubr.bf16.mxu1 %v3218_v4 }
 0x1f1   :  { %v3357_v17 = vpop.permute.xlu1 %927 }
 0x1f5   :  { %1877 = vmatmul.mubr.bf16.gmra.mrb[24].mxu1 %v3241_v44  ;;  %v3631_v44 = vld [vmem:[#allocation9_spill] sm:$0xff]  ;;  %v3370_v22 = vpop.permute.xlu1 %937 }
 0x1f6   :  { %1880 = vmatprep.mubr.bf16.mxu1 %v3250_v49  ;;  %v3632_v49 = vld [vmem:[#allocation38_spill] sm:$0xff] }
 0x1f9   :  { %v3380_v5 = vpop.permute.xlu1 %947 }
 0x1fd   :  { %1881 = vmatmul.mubr.bf16.gmra.mrb[28].mxu1 %v3268_v13  ;;  %v330_v13 = vadd.f32 %v3632_v49, %v3631_v44 }
 0x1ff   :  { %v384_v57 = vmax.f32 %v330_v13, 0.0 }
 0x272   :  { %v1806_v4 = vpop.f32.mrb[0].mxu1 }
 0x273   :  { %v1056_v37 = vadd.f32 %v1806_v4, %v3335_v51  ;;  %v1047_v25 = vpop.f32.mrb[1].mxu1 }
 0x274   :  { %v1048_v53 = vadd.f32 %v1047_v25, %v3331_v14  ;;  %v1807_v36 = vpop.f32.mrb[2].mxu1  ;;  %v3642_v25 = vld [vmem:[#allocation46_spill] sm:$0xff] }
 0x275   :  { %v1112_v16 = vmax.f32 %v1056_v37, 0.0  ;;  %v1059_v58 = vadd.f32 %v1807_v36, %v3337_v10  ;;  %v1050_v33 = vpop.f32.mrb[3].mxu1  ;;  %v3641_v37 = vld [vmem:[#allocation16_spill] sm:$0xff] }
 0x276   :  { %v1110_v0 = vmax.f32 %v1048_v53, 0.0  ;;  %v1051_v29 = vadd.f32 %v1050_v33, %v3333_v21  ;;  %v362_v53 = vadd.f32 %v3642_v25, %v3641_v37 }
 0x277   :  { %v1128_v12 = vadd.f32 %v1112_v16, %v383_v31  ;;  %v1113_v48 = vmax.f32 %v1059_v58, 0.0  ;;  %v3643_v16 = vld [vmem:[#allocation15_spill] sm:$0xff] }
 0x278   :  { %v1126_v34 = vadd.f32 %v1110_v0, %v381_v18  ;;  %v1111_v45 = vmax.f32 %v1051_v29, 0.0  ;;  %v3644_v58 = vld [vmem:[#allocation47_spill] sm:$0xff]  ;;  %v3645_v29 = vld [vmem:[#allocation44_spill] sm:$0xff] }
 0x279   :  { %1144 = vst [vmem:[#allocation2 + $0x10] sm:$0xff] %v1128_v12  ;;  %v1129_v20 = vadd.f32 %v1113_v48, %v384_v57  ;;  %v354_v33 = vadd.f32 %v3644_v58, %v3643_v16  ;;  %v391_v57 = vmax.f32 %v3645_v29, 0.0 }
 0x27a   :  { %1142 = vst [vmem:[#allocation2] sm:$0xff] %v1126_v34  ;;  %v1127_v27 = vadd.f32 %v1111_v45, %v382_v24  ;;  %v1810_v46 = vpop.f32.mrb[4].mxu1  ;;  %v3646_v24 = vld [vmem:[#allocation45_spill] sm:$0xff]  ;;  %v3386_v45 = vpop.permute.xlu0 %952 }
 0x27b   :  { %1145 = vst [vmem:[#allocation2 + $0x18] sm:$0xff] %v1129_v20  ;;  %v1072_v6 = vadd.f32 %v1810_v46, %v3345_v3  ;;  %v1063_v55 = vpop.f32.mrb[5].mxu1  ;;  %v389_v34 = vmax.f32 %v3646_v24, 0.0  ;;  %v392_v46 = vmax.f32 %v362_v53, 0.0 }
 0x27c   :  { %1143 = vst [vmem:[#allocation2 + $0x8] sm:$0xff] %v1127_v27  ;;  %v1064_v47 = vadd.f32 %v1063_v55, %v3339_v19  ;;  %v1811_v1 = vpop.f32.mrb[6].mxu1 }
 0x27d   :  { %v1116_v26 = vmax.f32 %v1072_v6, 0.0  ;;  %v1075_v30 = vadd.f32 %v1811_v1, %v3350_v39  ;;  %v1066_v42 = vpop.f32.mrb[7].mxu1  ;;  %v390_v6 = vmax.f32 %v354_v33, 0.0 }
 0x27e   :  { %v1114_v2 = vmax.f32 %v1064_v47, 0.0  ;;  %v1067_v11 = vadd.f32 %v1066_v42, %v3341_v32  ;;  %v3389_v47 = vpop.permute.xlu1 %957 }
 0x27f   :  { %v1132_v38 = vadd.f32 %v1116_v26, %v387_v8  ;;  %v1117_v63 = vmax.f32 %v1075_v30, 0.0  ;;  %v3647_v8 = vld [vmem:[#allocation18_spill] sm:$0xff]  ;;  %v3648_v26 = vld [vmem:[#allocation51_spill] sm:$0xff] }
 0x280   :  { %v1130_v61 = vadd.f32 %v1114_v2, %v385_v7  ;;  %v1115_v60 = vmax.f32 %v1067_v11, 0.0  ;;  %v378_v30 = vadd.f32 %v3648_v26, %v3647_v8  ;;  %v3649_v7 = vld [vmem:[#allocation17_spill] sm:$0xff]  ;;  %v3650_v2 = vld [vmem:[#allocation52_spill] sm:$0xff] }
 0x281   :  { %1148 = vst [vmem:[#allocation2 + $0x30] sm:$0xff] %v1132_v38  ;;  %v1133_v4 = vadd.f32 %v1117_v63, %v388_v59  ;;  %v370_v11 = vadd.f32 %v3650_v2, %v3649_v7  ;;  %v3396_v59 = vpop.permute.xlu0 %962 }
 0x282   :  { %1146 = vst [vmem:[#allocation2 + $0x20] sm:$0xff] %v1130_v61  ;;  %v1131_v49 = vadd.f32 %v1115_v60, %v386_v28  ;;  %v1814_v13 = vpop.f32.mrb[8].mxu1  ;;  %v3651_v28 = vld [vmem:[#allocation48_spill] sm:$0xff] }
 0x283   :  { %1149 = vst [vmem:[#allocation2 + $0x38] sm:$0xff] %v1133_v4  ;;  %v1088_v36 = vadd.f32 %v1814_v13, %v3370_v22  ;;  %v1079_v31 = vpop.f32.mrb[9].mxu1  ;;  %v395_v61 = vmax.f32 %v3651_v28, 0.0  ;;  %v3652_v13 = vld [vmem:[#allocation49_spill] sm:$0xff] }
 0x284   :  { %1147 = vst [vmem:[#allocation2 + $0x28] sm:$0xff] %v1131_v49  ;;  %v1080_v18 = vadd.f32 %v1079_v31, %v3357_v17  ;;  %v1815_v0 = vpop.f32.mrb[10].mxu1  ;;  %v393_v25 = vmax.f32 %v3652_v13, 0.0  ;;  %v396_v31 = vmax.f32 %v378_v30, 0.0 }
 0x285   :  { %v1120_v12 = vmax.f32 %v1088_v36, 0.0  ;;  %v1091_v48 = vadd.f32 %v1815_v0, %v3373_v62  ;;  %v1082_v41 = vpop.f32.mrb[11].mxu1 }
 0x286   :  { %v1118_v20 = vmax.f32 %v1080_v18, 0.0  ;;  %v1083_v27 = vadd.f32 %v1082_v41, %v3359_v15  ;;  %v394_v18 = vmax.f32 %v370_v11, 0.0 }
 0x287   :  { %v1136_v43 = vadd.f32 %v1120_v12, %v391_v57  ;;  %v1121_v50 = vmax.f32 %v1091_v48, 0.0  ;;  %v3653_v48 = vld [vmem:[#allocation54_spill] sm:$0xff] }
 0x288   :  { %v1134_v55 = vadd.f32 %v1118_v20, %v389_v34  ;;  %v1119_v9 = vmax.f32 %v1083_v27, 0.0  ;;  %v1226_v41 = vadd.f32 %v3653_v48, %v3629_v40  ;;  %v3654_v34 = vld [vmem:[#allocation56_spill] sm:$0xff] }
 0x289   :  { %1152 = vst [vmem:[#allocation2 + $0x50] sm:$0xff] %v1136_v43  ;;  %v1137_v35 = vadd.f32 %v1121_v50, %v392_v46  ;;  %v1229_v20 = vadd.f32 %v3654_v34, %v3631_v44  ;;  %v3656_v44 = vld [vmem:[#allocation58_spill] sm:$0xff] }
 0x28a   :  { %1150 = vst [vmem:[#allocation2 + $0x40] sm:$0xff] %v1134_v55  ;;  %v1135_v1 = vadd.f32 %v1119_v9, %v390_v6  ;;  %v1818_v54 = vpop.f32.mrb[12].mxu1  ;;  %v1282_v6 = vmax.f32 %v1226_v41, 0.0  ;;  %v1281_v2 = vmax.f32 %v3656_v44, 0.0  ;;  %v3661_v34 = vld [vmem:[#allocation70_spill] sm:$0xff] }
 0x28b   :  { %1153 = vst [vmem:[#allocation2 + $0x58] sm:$0xff] %v1137_v35  ;;  %v1104_v42 = vadd.f32 %v1818_v54, %v3389_v47  ;;  %v1095_v23 = vpop.f32.mrb[13].mxu1  ;;  %v1283_v30 = vmax.f32 %v1229_v20, 0.0 }
 0x28c   :  { %1151 = vst [vmem:[#allocation2 + $0x48] sm:$0xff] %v1135_v1  ;;  %v1096_v38 = vadd.f32 %v1095_v23, %v3380_v5  ;;  %v1819_v63 = vpop.f32.mrb[14].mxu1  ;;  %v3655_v1 = vld [vmem:[#allocation55_spill] sm:$0xff] }
 0x28d   :  { %v1124_v60 = vmax.f32 %v1104_v42, 0.0  ;;  %v1107_v4 = vadd.f32 %v1819_v63, %v3396_v59  ;;  %v1098_v49 = vpop.f32.mrb[15].mxu1  ;;  %v1280_v54 = vmax.f32 %v3655_v1, 0.0 }
 0x28e   :  { %v1122_v53 = vmax.f32 %v1096_v38, 0.0  ;;  %v1099_v36 = vadd.f32 %v1098_v49, %v3386_v45 }
 0x28f   :  { %v1140_v58 = vadd.f32 %v1124_v60, %v395_v61  ;;  %v1125_v33 = vmax.f32 %v1107_v4, 0.0 }
 0x290   :  { %v1138_v0 = vadd.f32 %v1122_v53, %v393_v25  ;;  %v1123_v29 = vmax.f32 %v1099_v36, 0.0  ;;  %v3659_v25 = vld [vmem:[#allocation61_spill] sm:$0xff] }
 0x291   :  { %1156 = vst [vmem:[#allocation2 + $0x70] sm:$0xff] %v1140_v58  ;;  %v1141_v57 = vadd.f32 %v1125_v33, %v396_v31  ;;  %v1286_v53 = vmax.f32 %v3659_v25, 0.0  ;;  %v3660_v33 = vld [vmem:[#allocation62_spill] sm:$0xff] }
 0x292   :  { %1154 = vst [vmem:[#allocation2 + $0x60] sm:$0xff] %v1138_v0  ;;  %v1139_v12 = vadd.f32 %v1123_v29, %v394_v18  ;;  %v1284_v18 = vmax.f32 %v3660_v33, 0.0 }
 0x293   :  { %1157 = vst [vmem:[#allocation2 + $0x78] sm:$0xff] %v1141_v57 }
 0x294   :  { %1155 = vst [vmem:[#allocation2 + $0x68] sm:$0xff] %v1139_v12 }
 0x2b8   :  { %v1870_v24 = vpop.f32.mrb[16].mxu1 }
 0x2b9   :  { %v1539_v27 = vadd.f32 %v1870_v24, %v3335_v51  ;;  %v1530_v46 = vpop.f32.mrb[17].mxu1 }
 0x2ba   :  { %v1531_v43 = vadd.f32 %v1530_v46, %v3331_v14  ;;  %v1871_v50 = vpop.f32.mrb[18].mxu1 }
 0x2bb   :  { %v1595_v55 = vmax.f32 %v1539_v27, 0.0  ;;  %v1542_v9 = vadd.f32 %v1871_v50, %v3337_v10  ;;  %v1533_v35 = vpop.f32.mrb[19].mxu1  ;;  %v3657_v10 = vld [vmem:[#allocation63_spill] sm:$0xff] }
 0x2bc   :  { %v1593_v26 = vmax.f32 %v1531_v43, 0.0  ;;  %v1534_v40 = vadd.f32 %v1533_v35, %v3333_v21  ;;  %v1245_v28 = vadd.f32 %v3657_v10, %v3635_v52  ;;  %v3658_v21 = vld [vmem:[#allocation64_spill] sm:$0xff] }
 0x2bd   :  { %v1611_v42 = vadd.f32 %v1595_v55, %v1282_v6  ;;  %v1596_v23 = vmax.f32 %v1542_v9, 0.0  ;;  %v1237_v4 = vadd.f32 %v3658_v21, %v3637_v56  ;;  %v3663_v6 = vld [vmem:[#allocation67_spill] sm:$0xff] }
 0x2be   :  { %v1609_v51 = vadd.f32 %v1593_v26, %v1280_v54  ;;  %v1594_v11 = vmax.f32 %v1534_v40, 0.0  ;;  %v1290_v55 = vmax.f32 %v3663_v6, 0.0  ;;  %v3664_v54 = vld [vmem:[#allocation69_spill] sm:$0xff] }
 0x2bf   :  { %1628 = vst [vmem:[#allocation2 + $0x90] sm:$0xff] %v1611_v42  ;;  %v1612_v14 = vadd.f32 %v1596_v23, %v1283_v30  ;;  %v1285_v12 = vmax.f32 %v1237_v4, 0.0  ;;  %v1288_v26 = vmax.f32 %v3664_v54, 0.0 }
 0x2c0   :  { %1626 = vst [vmem:[#allocation2 + $0x80] sm:$0xff] %v1609_v51  ;;  %v1610_v38 = vadd.f32 %v1594_v11, %v1281_v2  ;;  %v1874_v63 = vpop.f32.mrb[20].mxu1  ;;  %v3665_v11 = vld [vmem:[#allocation75_spill] sm:$0xff] }
 0x2c1   :  { %1629 = vst [vmem:[#allocation2 + $0x98] sm:$0xff] %v1612_v14  ;;  %v1555_v61 = vadd.f32 %v1874_v63, %v3345_v3  ;;  %v1546_v60 = vpop.f32.mrb[21].mxu1  ;;  %v1287_v3 = vmax.f32 %v1245_v28, 0.0 }
 0x2c2   :  { %1627 = vst [vmem:[#allocation2 + $0x88] sm:$0xff] %v1610_v38  ;;  %v1547_v49 = vadd.f32 %v1546_v60, %v3339_v19  ;;  %v1875_v13 = vpop.f32.mrb[22].mxu1 }
 0x2c3   :  { %v1599_v36 = vmax.f32 %v1555_v61, 0.0  ;;  %v1558_v31 = vadd.f32 %v1875_v13, %v3350_v39  ;;  %v1549_v58 = vpop.f32.mrb[23].mxu1  ;;  %v1261_v39 = vadd.f32 %v3661_v34, %v3641_v37  ;;  %v3667_v61 = vld [vmem:[#allocation73_spill] sm:$0xff]  ;;  %v3668_v13 = vld [vmem:[#allocation74_spill] sm:$0xff] }
 0x2c4   :  { %v1597_v52 = vmax.f32 %v1547_v49, 0.0  ;;  %v1550_v0 = vadd.f32 %v1549_v58, %v3341_v32  ;;  %v3662_v32 = vld [vmem:[#allocation71_spill] sm:$0xff]  ;;  %v1294_v60 = vmax.f32 %v3667_v61, 0.0  ;;  %v1292_v25 = vmax.f32 %v3668_v13, 0.0 }
 0x2c5   :  { %v1615_v29 = vadd.f32 %v1599_v36, %v1286_v53  ;;  %v1600_v57 = vmax.f32 %v1558_v31, 0.0  ;;  %v1253_v46 = vadd.f32 %v3662_v32, %v3643_v16 }
 0x2c6   :  { %v1613_v56 = vadd.f32 %v1597_v52, %v1284_v18  ;;  %v1598_v48 = vmax.f32 %v1550_v0, 0.0 }
 0x2c7   :  { %1632 = vst [vmem:[#allocation2 + $0xb0] sm:$0xff] %v1615_v29  ;;  %v1616_v19 = vadd.f32 %v1600_v57, %v1287_v3  ;;  %v1289_v23 = vmax.f32 %v1253_v46, 0.0 }
 0x2c8   :  { %1630 = vst [vmem:[#allocation2 + $0xa0] sm:$0xff] %v1613_v56  ;;  %v1614_v41 = vadd.f32 %v1598_v48, %v1285_v12  ;;  %v1878_v24 = vpop.f32.mrb[24].mxu1 }
 0x2c9   :  { %1633 = vst [vmem:[#allocation2 + $0xb8] sm:$0xff] %v1616_v19  ;;  %v1571_v20 = vadd.f32 %v1878_v24, %v3370_v22  ;;  %v1562_v27 = vpop.f32.mrb[25].mxu1  ;;  %v1291_v22 = vmax.f32 %v1261_v39, 0.0 }
 0x2ca   :  { %1631 = vst [vmem:[#allocation2 + $0xa8] sm:$0xff] %v1614_v41  ;;  %v1563_v43 = vadd.f32 %v1562_v27, %v3357_v17  ;;  %v1879_v50 = vpop.f32.mrb[26].mxu1 }
 0x2cb   :  { %v1603_v9 = vmax.f32 %v1571_v20, 0.0  ;;  %v1574_v35 = vadd.f32 %v1879_v50, %v3373_v62  ;;  %v1565_v1 = vpop.f32.mrb[27].mxu1  ;;  %v1277_v62 = vadd.f32 %v3665_v11, %v3647_v8 }
 0x2cc   :  { %v1601_v37 = vmax.f32 %v1563_v43, 0.0  ;;  %v1566_v40 = vadd.f32 %v1565_v1, %v3359_v15  ;;  %v3666_v15 = vld [vmem:[#allocation76_spill] sm:$0xff] }
 0x2cd   :  { %v1619_v30 = vadd.f32 %v1603_v9, %v1290_v55  ;;  %v1604_v42 = vmax.f32 %v1574_v35, 0.0  ;;  %v1269_v63 = vadd.f32 %v3666_v15, %v3649_v7 }
 0x2ce   :  { %v1617_v16 = vadd.f32 %v1601_v37, %v1288_v26  ;;  %v1602_v44 = vmax.f32 %v1566_v40, 0.0 }
 0x2cf   :  { %1636 = vst [vmem:[#allocation2 + $0xd0] sm:$0xff] %v1619_v30  ;;  %v1620_v17 = vadd.f32 %v1604_v42, %v1291_v22  ;;  %v1293_v7 = vmax.f32 %v1269_v63, 0.0 }
 0x2d0   :  { %1634 = vst [vmem:[#allocation2 + $0xc0] sm:$0xff] %v1617_v16  ;;  %v1618_v2 = vadd.f32 %v1602_v44, %v1289_v23  ;;  %v1882_v51 = vpop.f32.mrb[28].mxu1 }
 0x2d1   :  { %1637 = vst [vmem:[#allocation2 + $0xd8] sm:$0xff] %v1620_v17  ;;  %v1587_v14 = vadd.f32 %v1882_v51, %v3389_v47  ;;  %v1578_v38 = vpop.f32.mrb[29].mxu1  ;;  %v1295_v47 = vmax.f32 %v1277_v62, 0.0 }
 0x2d2   :  { %1635 = vst [vmem:[#allocation2 + $0xc8] sm:$0xff] %v1618_v2  ;;  %v1579_v10 = vadd.f32 %v1578_v38, %v3380_v5  ;;  %v1883_v28 = vpop.f32.mrb[30].mxu1 }
 0x2d3   :  { %v1607_v21 = vmax.f32 %v1587_v14, 0.0  ;;  %v1590_v4 = vadd.f32 %v1883_v28, %v3396_v59  ;;  %v1581_v49 = vpop.f32.mrb[31].mxu1 }
 0x2d4   :  { %v1605_v8 = vmax.f32 %v1579_v10, 0.0  ;;  %v1582_v53 = vadd.f32 %v1581_v49, %v3386_v45 }
 0x2d5   :  { %v1623_v36 = vadd.f32 %v1607_v21, %v1294_v60  ;;  %v1608_v31 = vmax.f32 %v1590_v4, 0.0 }
 0x2d6   :  { %v1621_v58 = vadd.f32 %v1605_v8, %v1292_v25  ;;  %v1606_v5 = vmax.f32 %v1582_v53, 0.0 }
 0x2d7   :  { %1640 = vst [vmem:[#allocation2 + $0xf0] sm:$0xff] %v1623_v36  ;;  %v1624_v33 = vadd.f32 %v1608_v31, %v1295_v47 }
 0x2d8   :  { %1638 = vst [vmem:[#allocation2 + $0xe0] sm:$0xff] %v1621_v58  ;;  %v1622_v18 = vadd.f32 %v1606_v5, %v1293_v7 }
 0x2d9   :  { %1641 = vst [vmem:[#allocation2 + $0xf8] sm:$0xff] %v1624_v33 }
 0x2da   :  { %1639 = vst [vmem:[#allocation2 + $0xe8] sm:$0xff] %v1622_v18 }
 0x2db   :  { %1975 = shalt.err (!%p1972_p4)
}
 0x2dc   :  { %s1976_s21 = scalar_lea.hbm %s3462_s7, 4096 }
 0x2dd   :  { %p1977_p5 = scmp.ne.s32.totalorder %s3462_s7, %s1976_s21  ;;  %p1980_p6 = scmp.lt.u32.totalorder %s1976_s21, %s3462_s7 }
 0x2df   :  { %p1982_p7 = pnand %p1980_p6, %p1977_p5 }
 0x2e1   :  { %1985 = shalt.err (!%p1982_p7)
}
 0x2e2   :  { %s1995_s25 = smov 128   ;;  %s1996_s30 = smov 8  }
 0x2e3   :  { %1653 = dma.vmem_to_hbm [thread:$0]  %s1648_s16, 4096, %s3462_s7, [#allocation3], %s1995_s25, %s1995_s25, %s1996_s30  }
 0x2e4   :  { %1986 = dma.done.wait [#allocation3], 4096  }
 0x2e5   :  { %1987 = vsyncadd [#allocation3], 4294963200 }
 0x2e6   :  { %1657 = vsyncpa [#allocation3], 1 }

</bundles_post_ra>
